<compile_context>
chip_gen: v6e
topology: v6e:2x2x1
jax: 0.10.0
libtpu: 0.0.40
codegen_flags: <defaults>
</compile_context>

<pallas_src>
import jax
import jax.numpy as jnp
from jax.experimental import pallas as pl
from jax.experimental.pallas import tpu as pltpu  # noqa: F401  (memory spaces if scaled up)


# ----------------------------------------------------------------------------
# Fused kernel: all LSTM layers (wavefront) + fc(+BN folded) + relu + MDN head.
# ----------------------------------------------------------------------------
def _make_fused_kernel(num_layers, T, B, H, D, KO, K):
    f32 = jnp.float32
    bf16 = jnp.bfloat16

    def kernel(*refs):
        idx = 0
        x_ref = refs[idx]; idx += 1          # (T*B, D)      bf16
        wih0_ref = refs[idx]; idx += 1       # (D, 4H)       bf16
        whh_ref = refs[idx]; idx += 1        # (L, H, 4H)    bf16
        if num_layers > 1:
            wihr_ref = refs[idx]; idx += 1   # (L-1, H, 4H)  bf16
        else:
            wihr_ref = None
        b_ref = refs[idx]; idx += 1          # (L, 4H)       f32
        wfc_ref = refs[idx]; idx += 1        # (H, H)        bf16 (BN folded)
        whead_ref = refs[idx]; idx += 1      # (H, 2KO+K)    bf16
        btail_ref = refs[idx]; idx += 1      # (1, H+2KO+K)  f32
        mu_ref, sigma_ref, alpha_ref = refs[idx:idx + 3]

        b_all = b_ref[...]                   # (L, 4H)
        btail = btail_ref[...]               # (1, H + 2KO + K)

        # Hoisted layer-0 input projection for all timesteps: one MXU matmul,
        # bias folded in; off the serial critical path.
        gates0 = jnp.dot(x_ref[...], wih0_ref[...],
                         preferred_element_type=f32) + b_all[0:1, :]   # (T*B, 4H)

        def cell(gates, c_prev):
            # 3 EUP pushes/step (sigmoid(4H), tanh(4H), tanh(c)); gate
            # extraction is static lane slicing (XLU slot has slack).
            sg = jax.nn.sigmoid(gates)
            th = jnp.tanh(gates)
            i_g = sg[:, 0 * H:1 * H]
            f_g = sg[:, 1 * H:2 * H]
            o_g = sg[:, 3 * H:4 * H]
            g_g = th[:, 2 * H:3 * H]
            c_new = f_g * c_prev + i_g * g_g
            h_new = o_g * jnp.tanh(c_new)
            return h_new, c_new

        h = [jnp.zeros((B, H), f32) for _ in range(num_layers)]
        c = [jnp.zeros((B, H), f32) for _ in range(num_layers)]

        # Wavefront: h[l][t] depends only on h[l][t-1] and h[l-1][t]; with the
        # fully unrolled t-outer / l-inner loop the LLO can overlap layer l+1
        # at timestep t with layer l at timestep t+1 (no inter-layer barrier).
        for t in range(T):
            g0 = gates0[t * B:(t + 1) * B, :] + jnp.dot(
                h[0].astype(bf16), whh_ref[0], preferred_element_type=f32)
            h[0], c[0] = cell(g0, c[0])
            for l in range(1, num_layers):
                gl = (jnp.dot(h[l - 1].astype(bf16), wihr_ref[l - 1],
                              preferred_element_type=f32)
                      + jnp.dot(h[l].astype(bf16), whh_ref[l],
                                preferred_element_type=f32)
                      + b_all[l:l + 1, :])
                h[l], c[l] = cell(gl, c[l])

        # ---- head: fc (BatchNorm pre-folded) + relu + fused MDN matmul ----
        z = jnp.dot(h[-1].astype(bf16), wfc_ref[...],
                    preferred_element_type=f32) + btail[:, :H]
        z = jnp.maximum(z, 0.0)                                    # relu
        head = jnp.dot(z.astype(bf16), whead_ref[...],
                       preferred_element_type=f32) + btail[:, H:]  # (B, 2KO+K)

        mu_ref[...] = head[:, :KO]
        sigma_ref[...] = jnp.maximum(jnp.exp(head[:, KO:2 * KO]), 1e-6)
        logits = head[:, 2 * KO:]
        m = jnp.max(logits, axis=-1, keepdims=True)
        e = jnp.exp(logits - m)
        alpha_ref[...] = e * pl.reciprocal(
            jnp.sum(e, axis=-1, keepdims=True), approx=True)

    return kernel


# ----------------------------------------------------------------------------
# Param packing (done once, outside the hot path): BN fold, head fusion,
# weight stacking, bf16 casts.
# ----------------------------------------------------------------------------
def pack_params(params):
    lstm = params["lstm"]
    L = len(lstm)

    # Fold eval-mode BatchNorm into the fc weights/bias (bit-identical).
    w_fc_fold = params["w_fc_t"] * params["bn_scale"]
    b_fc_fold = params["b_fc"] * params["bn_scale"] + params["bn_shift"]

    # Fuse the three MDN head matmuls into one.
    w_head = jnp.concatenate(
        [params["w_mu_t"], params["w_sigma_t"], params["w_alpha_t"]], axis=1)
    b_head = jnp.concatenate(
        [params["b_mu"], params["b_sigma"], params["b_alpha"]], axis=1)

    packed = dict(
        w_ih0=lstm[0]["w_ih_t"].astype(jnp.bfloat16),                      # (D, 4H)
        w_hh_all=jnp.stack([l["w_hh_t"] for l in lstm], 0).astype(jnp.bfloat16),
        bias_all=jnp.concatenate([l["bias"] for l in lstm], axis=0),       # (L, 4H) f32
        w_fc=w_fc_fold.astype(jnp.bfloat16),                               # (H, H)
        w_head=w_head.astype(jnp.bfloat16),                                # (H, 2KO+K)
        b_tail=jnp.concatenate([b_fc_fold, b_head], axis=1),               # (1, H+2KO+K) f32
    )
    if L > 1:
        packed["w_ih_rest"] = jnp.stack(
            [l["w_ih_t"] for l in lstm[1:]], 0).astype(jnp.bfloat16)       # (L-1, H, 4H)
    return packed


# ----------------------------------------------------------------------------
# Wrapper: one pallas_call for the whole forward pass.
# ----------------------------------------------------------------------------
def lstm_mdn_forward(x_btd, packed, num_mixtures, output_dim):
    B, T, D = x_btd.shape
    L, H = packed["w_hh_all"].shape[0], packed["w_hh_all"].shape[1]
    K = num_mixtures
    KO = num_mixtures * output_dim

    # Flatten to (T*B, D) in the wrapper (XLA), so the hoisted matmul operand
    # is already contiguous — no in-kernel reshape/relayout.
    x_flat = jnp.transpose(x_btd, (1, 0, 2)).reshape(T * B, D).astype(jnp.bfloat16)

    inputs = [x_flat, packed["w_ih0"], packed["w_hh_all"]]
    if L > 1:
        inputs.append(packed["w_ih_rest"])
    inputs += [packed["bias_all"], packed["w_fc"], packed["w_head"], packed["b_tail"]]

    kernel = _make_fused_kernel(L, T, B, H, D, KO, K)
    return pl.pallas_call(
        kernel,
        out_shape=(
            jax.ShapeDtypeStruct((B, KO), jnp.float32),
            jax.ShapeDtypeStruct((B, KO), jnp.float32),
            jax.ShapeDtypeStruct((B, K), jnp.float32),
        ),
    )(*inputs)


lstm_mdn_forward = jax.jit(lstm_mdn_forward, static_argnums=(2, 3))


# ----------------------------------------------------------------------------
# Deterministic parameter construction (PyTorch-style uniform init).
# ----------------------------------------------------------------------------
def make_params(key, input_dim, hidden_dim, num_layers, num_mixtures, output_dim):
    H = hidden_dim
    k = 1.0 / jnp.sqrt(jnp.float32(H))

    def unif(key, shape):
        return jax.random.uniform(key, shape, jnp.float32, -k, k)

    keys = jax.random.split(key, 4 * num_layers + 12)
    ki = iter(range(len(keys)))

    lstm = []
    for l in range(num_layers):
        d_in = input_dim if l == 0 else H
        w_ih = unif(keys[next(ki)], (4 * H, d_in))
        w_hh = unif(keys[next(ki)], (4 * H, H))
        b_ih = unif(keys[next(ki)], (4 * H,))
        b_hh = unif(keys[next(ki)], (4 * H,))
        lstm.append(dict(
            w_ih_t=w_ih.T,                             # (d_in, 4H)
            w_hh_t=w_hh.T,                             # (H, 4H)
            bias=(b_ih + b_hh).reshape(1, 4 * H),      # (1, 4H)
        ))

    w_fc = unif(keys[next(ki)], (H, H))
    b_fc = unif(keys[next(ki)], (H,))

    # BatchNorm1d (eval mode): fold running stats + affine into scale/shift.
    gamma = jax.random.uniform(keys[next(ki)], (H,), jnp.float32, 0.5, 1.5)
    beta = jax.random.uniform(keys[next(ki)], (H,), jnp.float32, -0.5, 0.5)
    running_mean = jnp.zeros((H,), jnp.float32)
    running_var = jnp.ones((H,), jnp.float32)
    eps = 1e-5
    bn_scale = gamma / jnp.sqrt(running_var + eps)
    bn_shift = beta - running_mean * bn_scale

    KO = num_mixtures * output_dim
    w_mu = unif(keys[next(ki)], (KO, H))
    b_mu = unif(keys[next(ki)], (KO,))
    w_sigma = unif(keys[next(ki)], (KO, H))
    b_sigma = unif(keys[next(ki)], (KO,))
    w_alpha = unif(keys[next(ki)], (num_mixtures, H))
    b_alpha = unif(keys[next(ki)], (num_mixtures,))

    return dict(
        lstm=lstm,
        w_fc_t=w_fc.T, b_fc=b_fc.reshape(1, H),
        bn_scale=bn_scale.reshape(1, H), bn_shift=bn_shift.reshape(1, H),
        w_mu_t=w_mu.T, b_mu=b_mu.reshape(1, KO),
        w_sigma_t=w_sigma.T, b_sigma=b_sigma.reshape(1, KO),
        w_alpha_t=w_alpha.T, b_alpha=b_alpha.reshape(1, num_mixtures),
    )


# ----------------------------------------------------------------------------
# Pure-JAX f32 reference for sanity check.
# ----------------------------------------------------------------------------
def reference_forward(x_btd, params):
    x = jnp.transpose(x_btd, (1, 0, 2))
    for lyr in params["lstm"]:
        T, B, _ = x.shape
        H = lyr["w_hh_t"].shape[0]
        h = jnp.zeros((B, H), jnp.float32)
        c = jnp.zeros((B, H), jnp.float32)
        outs = []
        for t in range(T):
            gates = x[t] @ lyr["w_ih_t"] + h @ lyr["w_hh_t"] + lyr["bias"]
            i = jax.nn.sigmoid(gates[:, 0 * H:1 * H])
            f = jax.nn.sigmoid(gates[:, 1 * H:2 * H])
            g = jnp.tanh(gates[:, 2 * H:3 * H])
            o = jax.nn.sigmoid(gates[:, 3 * H:4 * H])
            c = f * c + i * g
            h = o * jnp.tanh(c)
            outs.append(h)
        x = jnp.stack(outs, axis=0)
    last_h = x[-1]
    z = last_h @ params["w_fc_t"] + params["b_fc"]
    z = z * params["bn_scale"] + params["bn_shift"]
    z = jnp.maximum(z, 0.0)
    mu = z @ params["w_mu_t"] + params["b_mu"]
    sigma = jnp.maximum(jnp.exp(z @ params["w_sigma_t"] + params["b_sigma"]), 1e-6)
    alpha = jax.nn.softmax(z @ params["w_alpha_t"] + params["b_alpha"], axis=1)
    return mu, sigma, alpha


if __name__ == "__main__":
    B, T = 2, 8
    input_dim, hidden_dim, num_layers = 16, 32, 2
    num_mixtures, output_dim = 5, 3

    key = jax.random.PRNGKey(0)
    kx, kp = jax.random.split(key)
    x = jax.random.normal(kx, (B, T, input_dim), jnp.float32)
    params = make_params(kp, input_dim, hidden_dim, num_layers,
                         num_mixtures, output_dim)
    packed = pack_params(params)

    mu, sigma, alpha = lstm_mdn_forward(x, packed, num_mixtures, output_dim)
    jax.block_until_ready((mu, sigma, alpha))

    mu_r, sigma_r, alpha_r = reference_forward(x, params)
    assert mu.shape == (B, num_mixtures * output_dim)
    assert sigma.shape == (B, num_mixtures * output_dim)
    assert alpha.shape == (B, num_mixtures)
    # Tolerances loosened: bf16 MXU operands + approx reciprocal (alpha rows
    # sum to ~1 rather than exactly 1), f32 reference.
    assert jnp.allclose(mu, mu_r, rtol=5e-2, atol=5e-2)
    assert jnp.allclose(sigma, sigma_r, rtol=5e-2, atol=5e-2)
    assert jnp.allclose(alpha, alpha_r, rtol=5e-2, atol=5e-2)

    print("KERNEL_OK")
</pallas_src>

<mosaic_0001>
module attributes {stable_mosaic.version = 11 : i64} {
  func.func @kernel(%arg0: memref<16x16xbf16, #tpu.memory_space<vmem>>, %arg1: memref<16x128xbf16, #tpu.memory_space<vmem>>, %arg2: memref<2x32x128xbf16, #tpu.memory_space<vmem>>, %arg3: memref<1x32x128xbf16, #tpu.memory_space<vmem>>, %arg4: memref<2x128xf32, #tpu.memory_space<vmem>>, %arg5: memref<32x32xbf16, #tpu.memory_space<vmem>>, %arg6: memref<32x35xbf16, #tpu.memory_space<vmem>>, %arg7: memref<1x67xf32, #tpu.memory_space<vmem>>, %arg8: memref<2x15xf32, #tpu.memory_space<vmem>>, %arg9: memref<2x15xf32, #tpu.memory_space<vmem>>, %arg10: memref<2x5xf32, #tpu.memory_space<vmem>>) attributes {dimension_semantics = [], scalar_prefetch = 0 : i64, scratch_operands = 0 : i64, tpu.core_type = #tpu.core_type<tc>} {
    %c0 = arith.constant 0 : index
    %c0_0 = arith.constant 0 : index
    %0 = vector.load %arg4[%c0, %c0_0] : memref<2x128xf32, #tpu.memory_space<vmem>>, vector<2x128xf32>
    %c0_1 = arith.constant 0 : index
    %c0_2 = arith.constant 0 : index
    %1 = vector.load %arg7[%c0_1, %c0_2] : memref<1x67xf32, #tpu.memory_space<vmem>>, vector<1x67xf32>
    %c0_3 = arith.constant 0 : index
    %c0_4 = arith.constant 0 : index
    %2 = vector.load %arg0[%c0_3, %c0_4] : memref<16x16xbf16, #tpu.memory_space<vmem>>, vector<16x16xbf16>
    %c0_5 = arith.constant 0 : index
    %c0_6 = arith.constant 0 : index
    %3 = vector.load %arg1[%c0_5, %c0_6] : memref<16x128xbf16, #tpu.memory_space<vmem>>, vector<16x128xbf16>
    %cst = arith.constant dense<0.000000e+00> : vector<16x128xf32>
    %4 = tpu.matmul %2, %3, %cst {dimension_numbers = #tpu.dot_dimension_numbers<[1], [0], [0], [1], [0, 0, 1, 1], [], []>} : vector<16x16xbf16>, vector<16x128xbf16>, vector<16x128xf32> -> vector<16x128xf32>
    %5 = vector.extract_strided_slice %0 {offsets = [0, 0], sizes = [1, 128], strides = [1, 1]} : vector<2x128xf32> to vector<1x128xf32>
    %6 = vector.broadcast %5 : vector<1x128xf32> to vector<16x128xf32>
    %7 = arith.addf %4, %6 : vector<16x128xf32>
    %cst_7 = arith.constant 0.000000e+00 : f32
    %8 = vector.broadcast %cst_7 : f32 to vector<2x32xf32>
    %cst_8 = arith.constant 0.000000e+00 : f32
    %9 = vector.broadcast %cst_8 : f32 to vector<2x32xf32>
    %cst_9 = arith.constant 0.000000e+00 : f32
    %10 = vector.broadcast %cst_9 : f32 to vector<2x32xf32>
    %cst_10 = arith.constant 0.000000e+00 : f32
    %11 = vector.broadcast %cst_10 : f32 to vector<2x32xf32>
    %12 = vector.extract_strided_slice %7 {offsets = [0, 0], sizes = [2, 128], strides = [1, 1]} : vector<16x128xf32> to vector<2x128xf32>
    %13 = arith.truncf %8 : vector<2x32xf32> to vector<2x32xbf16>
    %c0_11 = arith.constant 0 : index
    %c0_12 = arith.constant 0 : index
    %c0_13 = arith.constant 0 : index
    %14 = vector.load %arg2[%c0_11, %c0_12, %c0_13] : memref<2x32x128xbf16, #tpu.memory_space<vmem>>, vector<1x32x128xbf16>
    %15 = vector.shape_cast %14 : vector<1x32x128xbf16> to vector<32x128xbf16>
    %cst_14 = arith.constant dense<0.000000e+00> : vector<2x128xf32>
    %16 = tpu.matmul %13, %15, %cst_14 {dimension_numbers = #tpu.dot_dimension_numbers<[1], [0], [0], [1], [0, 0, 1, 1], [], []>} : vector<2x32xbf16>, vector<32x128xbf16>, vector<2x128xf32> -> vector<2x128xf32>
    %17 = arith.addf %12, %16 : vector<2x128xf32>
    %18 = arith.negf %17 : vector<2x128xf32>
    %19 = math.exp %18 : vector<2x128xf32>
    %cst_15 = arith.constant 1.000000e+00 : f32
    %20 = vector.broadcast %cst_15 : f32 to vector<2x128xf32>
    %21 = arith.addf %20, %19 : vector<2x128xf32>
    %22 = arith.divf %20, %21 : vector<2x128xf32>
    %23 = math.tanh %17 : vector<2x128xf32>
    %24 = vector.extract_strided_slice %22 {offsets = [0, 0], sizes = [2, 32], strides = [1, 1]} : vector<2x128xf32> to vector<2x32xf32>
    %25 = vector.extract_strided_slice %22 {offsets = [0, 32], sizes = [2, 32], strides = [1, 1]} : vector<2x128xf32> to vector<2x32xf32>
    %26 = vector.extract_strided_slice %22 {offsets = [0, 96], sizes = [2, 32], strides = [1, 1]} : vector<2x128xf32> to vector<2x32xf32>
    %27 = vector.extract_strided_slice %23 {offsets = [0, 64], sizes = [2, 32], strides = [1, 1]} : vector<2x128xf32> to vector<2x32xf32>
    %28 = arith.mulf %25, %10 : vector<2x32xf32>
    %29 = arith.mulf %24, %27 : vector<2x32xf32>
    %30 = arith.addf %28, %29 : vector<2x32xf32>
    %31 = math.tanh %30 : vector<2x32xf32>
    %32 = arith.mulf %26, %31 : vector<2x32xf32>
    %33 = arith.truncf %32 : vector<2x32xf32> to vector<2x32xbf16>
    %c0_16 = arith.constant 0 : index
    %c0_17 = arith.constant 0 : index
    %c0_18 = arith.constant 0 : index
    %34 = vector.load %arg3[%c0_16, %c0_17, %c0_18] : memref<1x32x128xbf16, #tpu.memory_space<vmem>>, vector<1x32x128xbf16>
    %35 = vector.shape_cast %34 : vector<1x32x128xbf16> to vector<32x128xbf16>
    %cst_19 = arith.constant dense<0.000000e+00> : vector<2x128xf32>
    %36 = tpu.matmul %33, %35, %cst_19 {dimension_numbers = #tpu.dot_dimension_numbers<[1], [0], [0], [1], [0, 0, 1, 1], [], []>} : vector<2x32xbf16>, vector<32x128xbf16>, vector<2x128xf32> -> vector<2x128xf32>
    %37 = arith.truncf %9 : vector<2x32xf32> to vector<2x32xbf16>
    %c1 = arith.constant 1 : index
    %c0_20 = arith.constant 0 : index
    %c0_21 = arith.constant 0 : index
    %38 = vector.load %arg2[%c1, %c0_20, %c0_21] : memref<2x32x128xbf16, #tpu.memory_space<vmem>>, vector<1x32x128xbf16>
    %39 = vector.shape_cast %38 : vector<1x32x128xbf16> to vector<32x128xbf16>
    %cst_22 = arith.constant dense<0.000000e+00> : vector<2x128xf32>
    %40 = tpu.matmul %37, %39, %cst_22 {dimension_numbers = #tpu.dot_dimension_numbers<[1], [0], [0], [1], [0, 0, 1, 1], [], []>} : vector<2x32xbf16>, vector<32x128xbf16>, vector<2x128xf32> -> vector<2x128xf32>
    %41 = arith.addf %36, %40 : vector<2x128xf32>
    %42 = vector.extract_strided_slice %0 {offsets = [1, 0], sizes = [1, 128], strides = [1, 1]} : vector<2x128xf32> to vector<1x128xf32>
    %43 = vector.broadcast %42 : vector<1x128xf32> to vector<2x128xf32>
    %44 = arith.addf %41, %43 : vector<2x128xf32>
    %45 = arith.negf %44 : vector<2x128xf32>
    %46 = math.exp %45 : vector<2x128xf32>
    %cst_23 = arith.constant 1.000000e+00 : f32
    %47 = vector.broadcast %cst_23 : f32 to vector<2x128xf32>
    %48 = arith.addf %47, %46 : vector<2x128xf32>
    %49 = arith.divf %47, %48 : vector<2x128xf32>
    %50 = math.tanh %44 : vector<2x128xf32>
    %51 = vector.extract_strided_slice %49 {offsets = [0, 0], sizes = [2, 32], strides = [1, 1]} : vector<2x128xf32> to vector<2x32xf32>
    %52 = vector.extract_strided_slice %49 {offsets = [0, 32], sizes = [2, 32], strides = [1, 1]} : vector<2x128xf32> to vector<2x32xf32>
    %53 = vector.extract_strided_slice %49 {offsets = [0, 96], sizes = [2, 32], strides = [1, 1]} : vector<2x128xf32> to vector<2x32xf32>
    %54 = vector.extract_strided_slice %50 {offsets = [0, 64], sizes = [2, 32], strides = [1, 1]} : vector<2x128xf32> to vector<2x32xf32>
    %55 = arith.mulf %52, %11 : vector<2x32xf32>
    %56 = arith.mulf %51, %54 : vector<2x32xf32>
    %57 = arith.addf %55, %56 : vector<2x32xf32>
    %58 = math.tanh %57 : vector<2x32xf32>
    %59 = arith.mulf %53, %58 : vector<2x32xf32>
    %60 = vector.extract_strided_slice %7 {offsets = [2, 0], sizes = [2, 128], strides = [1, 1]} : vector<16x128xf32> to vector<2x128xf32>
    %61 = arith.truncf %32 : vector<2x32xf32> to vector<2x32xbf16>
    %c0_24 = arith.constant 0 : index
    %c0_25 = arith.constant 0 : index
    %c0_26 = arith.constant 0 : index
    %62 = vector.load %arg2[%c0_24, %c0_25, %c0_26] : memref<2x32x128xbf16, #tpu.memory_space<vmem>>, vector<1x32x128xbf16>
    %63 = vector.shape_cast %62 : vector<1x32x128xbf16> to vector<32x128xbf16>
    %cst_27 = arith.constant dense<0.000000e+00> : vector<2x128xf32>
    %64 = tpu.matmul %61, %63, %cst_27 {dimension_numbers = #tpu.dot_dimension_numbers<[1], [0], [0], [1], [0, 0, 1, 1], [], []>} : vector<2x32xbf16>, vector<32x128xbf16>, vector<2x128xf32> -> vector<2x128xf32>
    %65 = arith.addf %60, %64 : vector<2x128xf32>
    %66 = arith.negf %65 : vector<2x128xf32>
    %67 = math.exp %66 : vector<2x128xf32>
    %cst_28 = arith.constant 1.000000e+00 : f32
    %68 = vector.broadcast %cst_28 : f32 to vector<2x128xf32>
    %69 = arith.addf %68, %67 : vector<2x128xf32>
    %70 = arith.divf %68, %69 : vector<2x128xf32>
    %71 = math.tanh %65 : vector<2x128xf32>
    %72 = vector.extract_strided_slice %70 {offsets = [0, 0], sizes = [2, 32], strides = [1, 1]} : vector<2x128xf32> to vector<2x32xf32>
    %73 = vector.extract_strided_slice %70 {offsets = [0, 32], sizes = [2, 32], strides = [1, 1]} : vector<2x128xf32> to vector<2x32xf32>
    %74 = vector.extract_strided_slice %70 {offsets = [0, 96], sizes = [2, 32], strides = [1, 1]} : vector<2x128xf32> to vector<2x32xf32>
    %75 = vector.extract_strided_slice %71 {offsets = [0, 64], sizes = [2, 32], strides = [1, 1]} : vector<2x128xf32> to vector<2x32xf32>
    %76 = arith.mulf %73, %30 : vector<2x32xf32>
    %77 = arith.mulf %72, %75 : vector<2x32xf32>
    %78 = arith.addf %76, %77 : vector<2x32xf32>
    %79 = math.tanh %78 : vector<2x32xf32>
    %80 = arith.mulf %74, %79 : vector<2x32xf32>
    %81 = arith.truncf %80 : vector<2x32xf32> to vector<2x32xbf16>
    %c0_29 = arith.constant 0 : index
    %c0_30 = arith.constant 0 : index
    %c0_31 = arith.constant 0 : index
    %82 = vector.load %arg3[%c0_29, %c0_30, %c0_31] : memref<1x32x128xbf16, #tpu.memory_space<vmem>>, vector<1x32x128xbf16>
    %83 = vector.shape_cast %82 : vector<1x32x128xbf16> to vector<32x128xbf16>
    %cst_32 = arith.constant dense<0.000000e+00> : vector<2x128xf32>
    %84 = tpu.matmul %81, %83, %cst_32 {dimension_numbers = #tpu.dot_dimension_numbers<[1], [0], [0], [1], [0, 0, 1, 1], [], []>} : vector<2x32xbf16>, vector<32x128xbf16>, vector<2x128xf32> -> vector<2x128xf32>
    %85 = arith.truncf %59 : vector<2x32xf32> to vector<2x32xbf16>
    %c1_33 = arith.constant 1 : index
    %c0_34 = arith.constant 0 : index
    %c0_35 = arith.constant 0 : index
    %86 = vector.load %arg2[%c1_33, %c0_34, %c0_35] : memref<2x32x128xbf16, #tpu.memory_space<vmem>>, vector<1x32x128xbf16>
    %87 = vector.shape_cast %86 : vector<1x32x128xbf16> to vector<32x128xbf16>
    %cst_36 = arith.constant dense<0.000000e+00> : vector<2x128xf32>
    %88 = tpu.matmul %85, %87, %cst_36 {dimension_numbers = #tpu.dot_dimension_numbers<[1], [0], [0], [1], [0, 0, 1, 1], [], []>} : vector<2x32xbf16>, vector<32x128xbf16>, vector<2x128xf32> -> vector<2x128xf32>
    %89 = arith.addf %84, %88 : vector<2x128xf32>
    %90 = vector.extract_strided_slice %0 {offsets = [1, 0], sizes = [1, 128], strides = [1, 1]} : vector<2x128xf32> to vector<1x128xf32>
    %91 = vector.broadcast %90 : vector<1x128xf32> to vector<2x128xf32>
    %92 = arith.addf %89, %91 : vector<2x128xf32>
    %93 = arith.negf %92 : vector<2x128xf32>
    %94 = math.exp %93 : vector<2x128xf32>
    %cst_37 = arith.constant 1.000000e+00 : f32
    %95 = vector.broadcast %cst_37 : f32 to vector<2x128xf32>
    %96 = arith.addf %95, %94 : vector<2x128xf32>
    %97 = arith.divf %95, %96 : vector<2x128xf32>
    %98 = math.tanh %92 : vector<2x128xf32>
    %99 = vector.extract_strided_slice %97 {offsets = [0, 0], sizes = [2, 32], strides = [1, 1]} : vector<2x128xf32> to vector<2x32xf32>
    %100 = vector.extract_strided_slice %97 {offsets = [0, 32], sizes = [2, 32], strides = [1, 1]} : vector<2x128xf32> to vector<2x32xf32>
    %101 = vector.extract_strided_slice %97 {offsets = [0, 96], sizes = [2, 32], strides = [1, 1]} : vector<2x128xf32> to vector<2x32xf32>
    %102 = vector.extract_strided_slice %98 {offsets = [0, 64], sizes = [2, 32], strides = [1, 1]} : vector<2x128xf32> to vector<2x32xf32>
    %103 = arith.mulf %100, %57 : vector<2x32xf32>
    %104 = arith.mulf %99, %102 : vector<2x32xf32>
    %105 = arith.addf %103, %104 : vector<2x32xf32>
    %106 = math.tanh %105 : vector<2x32xf32>
    %107 = arith.mulf %101, %106 : vector<2x32xf32>
    %108 = vector.extract_strided_slice %7 {offsets = [4, 0], sizes = [2, 128], strides = [1, 1]} : vector<16x128xf32> to vector<2x128xf32>
    %109 = arith.truncf %80 : vector<2x32xf32> to vector<2x32xbf16>
    %c0_38 = arith.constant 0 : index
    %c0_39 = arith.constant 0 : index
    %c0_40 = arith.constant 0 : index
    %110 = vector.load %arg2[%c0_38, %c0_39, %c0_40] : memref<2x32x128xbf16, #tpu.memory_space<vmem>>, vector<1x32x128xbf16>
    %111 = vector.shape_cast %110 : vector<1x32x128xbf16> to vector<32x128xbf16>
    %cst_41 = arith.constant dense<0.000000e+00> : vector<2x128xf32>
    %112 = tpu.matmul %109, %111, %cst_41 {dimension_numbers = #tpu.dot_dimension_numbers<[1], [0], [0], [1], [0, 0, 1, 1], [], []>} : vector<2x32xbf16>, vector<32x128xbf16>, vector<2x128xf32> -> vector<2x128xf32>
    %113 = arith.addf %108, %112 : vector<2x128xf32>
    %114 = arith.negf %113 : vector<2x128xf32>
    %115 = math.exp %114 : vector<2x128xf32>
    %cst_42 = arith.constant 1.000000e+00 : f32
    %116 = vector.broadcast %cst_42 : f32 to vector<2x128xf32>
    %117 = arith.addf %116, %115 : vector<2x128xf32>
    %118 = arith.divf %116, %117 : vector<2x128xf32>
    %119 = math.tanh %113 : vector<2x128xf32>
    %120 = vector.extract_strided_slice %118 {offsets = [0, 0], sizes = [2, 32], strides = [1, 1]} : vector<2x128xf32> to vector<2x32xf32>
    %121 = vector.extract_strided_slice %118 {offsets = [0, 32], sizes = [2, 32], strides = [1, 1]} : vector<2x128xf32> to vector<2x32xf32>
    %122 = vector.extract_strided_slice %118 {offsets = [0, 96], sizes = [2, 32], strides = [1, 1]} : vector<2x128xf32> to vector<2x32xf32>
    %123 = vector.extract_strided_slice %119 {offsets = [0, 64], sizes = [2, 32], strides = [1, 1]} : vector<2x128xf32> to vector<2x32xf32>
    %124 = arith.mulf %121, %78 : vector<2x32xf32>
    %125 = arith.mulf %120, %123 : vector<2x32xf32>
    %126 = arith.addf %124, %125 : vector<2x32xf32>
    %127 = math.tanh %126 : vector<2x32xf32>
    %128 = arith.mulf %122, %127 : vector<2x32xf32>
    %129 = arith.truncf %128 : vector<2x32xf32> to vector<2x32xbf16>
    %c0_43 = arith.constant 0 : index
    %c0_44 = arith.constant 0 : index
    %c0_45 = arith.constant 0 : index
    %130 = vector.load %arg3[%c0_43, %c0_44, %c0_45] : memref<1x32x128xbf16, #tpu.memory_space<vmem>>, vector<1x32x128xbf16>
    %131 = vector.shape_cast %130 : vector<1x32x128xbf16> to vector<32x128xbf16>
    %cst_46 = arith.constant dense<0.000000e+00> : vector<2x128xf32>
    %132 = tpu.matmul %129, %131, %cst_46 {dimension_numbers = #tpu.dot_dimension_numbers<[1], [0], [0], [1], [0, 0, 1, 1], [], []>} : vector<2x32xbf16>, vector<32x128xbf16>, vector<2x128xf32> -> vector<2x128xf32>
    %133 = arith.truncf %107 : vector<2x32xf32> to vector<2x32xbf16>
    %c1_47 = arith.constant 1 : index
    %c0_48 = arith.constant 0 : index
    %c0_49 = arith.constant 0 : index
    %134 = vector.load %arg2[%c1_47, %c0_48, %c0_49] : memref<2x32x128xbf16, #tpu.memory_space<vmem>>, vector<1x32x128xbf16>
    %135 = vector.shape_cast %134 : vector<1x32x128xbf16> to vector<32x128xbf16>
    %cst_50 = arith.constant dense<0.000000e+00> : vector<2x128xf32>
    %136 = tpu.matmul %133, %135, %cst_50 {dimension_numbers = #tpu.dot_dimension_numbers<[1], [0], [0], [1], [0, 0, 1, 1], [], []>} : vector<2x32xbf16>, vector<32x128xbf16>, vector<2x128xf32> -> vector<2x128xf32>
    %137 = arith.addf %132, %136 : vector<2x128xf32>
    %138 = vector.extract_strided_slice %0 {offsets = [1, 0], sizes = [1, 128], strides = [1, 1]} : vector<2x128xf32> to vector<1x128xf32>
    %139 = vector.broadcast %138 : vector<1x128xf32> to vector<2x128xf32>
    %140 = arith.addf %137, %139 : vector<2x128xf32>
    %141 = arith.negf %140 : vector<2x128xf32>
    %142 = math.exp %141 : vector<2x128xf32>
    %cst_51 = arith.constant 1.000000e+00 : f32
    %143 = vector.broadcast %cst_51 : f32 to vector<2x128xf32>
    %144 = arith.addf %143, %142 : vector<2x128xf32>
    %145 = arith.divf %143, %144 : vector<2x128xf32>
    %146 = math.tanh %140 : vector<2x128xf32>
    %147 = vector.extract_strided_slice %145 {offsets = [0, 0], sizes = [2, 32], strides = [1, 1]} : vector<2x128xf32> to vector<2x32xf32>
    %148 = vector.extract_strided_slice %145 {offsets = [0, 32], sizes = [2, 32], strides = [1, 1]} : vector<2x128xf32> to vector<2x32xf32>
    %149 = vector.extract_strided_slice %145 {offsets = [0, 96], sizes = [2, 32], strides = [1, 1]} : vector<2x128xf32> to vector<2x32xf32>
    %150 = vector.extract_strided_slice %146 {offsets = [0, 64], sizes = [2, 32], strides = [1, 1]} : vector<2x128xf32> to vector<2x32xf32>
    %151 = arith.mulf %148, %105 : vector<2x32xf32>
    %152 = arith.mulf %147, %150 : vector<2x32xf32>
    %153 = arith.addf %151, %152 : vector<2x32xf32>
    %154 = math.tanh %153 : vector<2x32xf32>
    %155 = arith.mulf %149, %154 : vector<2x32xf32>
    %156 = vector.extract_strided_slice %7 {offsets = [6, 0], sizes = [2, 128], strides = [1, 1]} : vector<16x128xf32> to vector<2x128xf32>
    %157 = arith.truncf %128 : vector<2x32xf32> to vector<2x32xbf16>
    %c0_52 = arith.constant 0 : index
    %c0_53 = arith.constant 0 : index
    %c0_54 = arith.constant 0 : index
    %158 = vector.load %arg2[%c0_52, %c0_53, %c0_54] : memref<2x32x128xbf16, #tpu.memory_space<vmem>>, vector<1x32x128xbf16>
    %159 = vector.shape_cast %158 : vector<1x32x128xbf16> to vector<32x128xbf16>
    %cst_55 = arith.constant dense<0.000000e+00> : vector<2x128xf32>
    %160 = tpu.matmul %157, %159, %cst_55 {dimension_numbers = #tpu.dot_dimension_numbers<[1], [0], [0], [1], [0, 0, 1, 1], [], []>} : vector<2x32xbf16>, vector<32x128xbf16>, vector<2x128xf32> -> vector<2x128xf32>
    %161 = arith.addf %156, %160 : vector<2x128xf32>
    %162 = arith.negf %161 : vector<2x128xf32>
    %163 = math.exp %162 : vector<2x128xf32>
    %cst_56 = arith.constant 1.000000e+00 : f32
    %164 = vector.broadcast %cst_56 : f32 to vector<2x128xf32>
    %165 = arith.addf %164, %163 : vector<2x128xf32>
    %166 = arith.divf %164, %165 : vector<2x128xf32>
    %167 = math.tanh %161 : vector<2x128xf32>
    %168 = vector.extract_strided_slice %166 {offsets = [0, 0], sizes = [2, 32], strides = [1, 1]} : vector<2x128xf32> to vector<2x32xf32>
    %169 = vector.extract_strided_slice %166 {offsets = [0, 32], sizes = [2, 32], strides = [1, 1]} : vector<2x128xf32> to vector<2x32xf32>
    %170 = vector.extract_strided_slice %166 {offsets = [0, 96], sizes = [2, 32], strides = [1, 1]} : vector<2x128xf32> to vector<2x32xf32>
    %171 = vector.extract_strided_slice %167 {offsets = [0, 64], sizes = [2, 32], strides = [1, 1]} : vector<2x128xf32> to vector<2x32xf32>
    %172 = arith.mulf %169, %126 : vector<2x32xf32>
    %173 = arith.mulf %168, %171 : vector<2x32xf32>
    %174 = arith.addf %172, %173 : vector<2x32xf32>
    %175 = math.tanh %174 : vector<2x32xf32>
    %176 = arith.mulf %170, %175 : vector<2x32xf32>
    %177 = arith.truncf %176 : vector<2x32xf32> to vector<2x32xbf16>
    %c0_57 = arith.constant 0 : index
    %c0_58 = arith.constant 0 : index
    %c0_59 = arith.constant 0 : index
    %178 = vector.load %arg3[%c0_57, %c0_58, %c0_59] : memref<1x32x128xbf16, #tpu.memory_space<vmem>>, vector<1x32x128xbf16>
    %179 = vector.shape_cast %178 : vector<1x32x128xbf16> to vector<32x128xbf16>
    %cst_60 = arith.constant dense<0.000000e+00> : vector<2x128xf32>
    %180 = tpu.matmul %177, %179, %cst_60 {dimension_numbers = #tpu.dot_dimension_numbers<[1], [0], [0], [1], [0, 0, 1, 1], [], []>} : vector<2x32xbf16>, vector<32x128xbf16>, vector<2x128xf32> -> vector<2x128xf32>
    %181 = arith.truncf %155 : vector<2x32xf32> to vector<2x32xbf16>
    %c1_61 = arith.constant 1 : index
    %c0_62 = arith.constant 0 : index
    %c0_63 = arith.constant 0 : index
    %182 = vector.load %arg2[%c1_61, %c0_62, %c0_63] : memref<2x32x128xbf16, #tpu.memory_space<vmem>>, vector<1x32x128xbf16>
    %183 = vector.shape_cast %182 : vector<1x32x128xbf16> to vector<32x128xbf16>
    %cst_64 = arith.constant dense<0.000000e+00> : vector<2x128xf32>
    %184 = tpu.matmul %181, %183, %cst_64 {dimension_numbers = #tpu.dot_dimension_numbers<[1], [0], [0], [1], [0, 0, 1, 1], [], []>} : vector<2x32xbf16>, vector<32x128xbf16>, vector<2x128xf32> -> vector<2x128xf32>
    %185 = arith.addf %180, %184 : vector<2x128xf32>
    %186 = vector.extract_strided_slice %0 {offsets = [1, 0], sizes = [1, 128], strides = [1, 1]} : vector<2x128xf32> to vector<1x128xf32>
    %187 = vector.broadcast %186 : vector<1x128xf32> to vector<2x128xf32>
    %188 = arith.addf %185, %187 : vector<2x128xf32>
    %189 = arith.negf %188 : vector<2x128xf32>
    %190 = math.exp %189 : vector<2x128xf32>
    %cst_65 = arith.constant 1.000000e+00 : f32
    %191 = vector.broadcast %cst_65 : f32 to vector<2x128xf32>
    %192 = arith.addf %191, %190 : vector<2x128xf32>
    %193 = arith.divf %191, %192 : vector<2x128xf32>
    %194 = math.tanh %188 : vector<2x128xf32>
    %195 = vector.extract_strided_slice %193 {offsets = [0, 0], sizes = [2, 32], strides = [1, 1]} : vector<2x128xf32> to vector<2x32xf32>
    %196 = vector.extract_strided_slice %193 {offsets = [0, 32], sizes = [2, 32], strides = [1, 1]} : vector<2x128xf32> to vector<2x32xf32>
    %197 = vector.extract_strided_slice %193 {offsets = [0, 96], sizes = [2, 32], strides = [1, 1]} : vector<2x128xf32> to vector<2x32xf32>
    %198 = vector.extract_strided_slice %194 {offsets = [0, 64], sizes = [2, 32], strides = [1, 1]} : vector<2x128xf32> to vector<2x32xf32>
    %199 = arith.mulf %196, %153 : vector<2x32xf32>
    %200 = arith.mulf %195, %198 : vector<2x32xf32>
    %201 = arith.addf %199, %200 : vector<2x32xf32>
    %202 = math.tanh %201 : vector<2x32xf32>
    %203 = arith.mulf %197, %202 : vector<2x32xf32>
    %204 = vector.extract_strided_slice %7 {offsets = [8, 0], sizes = [2, 128], strides = [1, 1]} : vector<16x128xf32> to vector<2x128xf32>
    %205 = arith.truncf %176 : vector<2x32xf32> to vector<2x32xbf16>
    %c0_66 = arith.constant 0 : index
    %c0_67 = arith.constant 0 : index
    %c0_68 = arith.constant 0 : index
    %206 = vector.load %arg2[%c0_66, %c0_67, %c0_68] : memref<2x32x128xbf16, #tpu.memory_space<vmem>>, vector<1x32x128xbf16>
    %207 = vector.shape_cast %206 : vector<1x32x128xbf16> to vector<32x128xbf16>
    %cst_69 = arith.constant dense<0.000000e+00> : vector<2x128xf32>
    %208 = tpu.matmul %205, %207, %cst_69 {dimension_numbers = #tpu.dot_dimension_numbers<[1], [0], [0], [1], [0, 0, 1, 1], [], []>} : vector<2x32xbf16>, vector<32x128xbf16>, vector<2x128xf32> -> vector<2x128xf32>
    %209 = arith.addf %204, %208 : vector<2x128xf32>
    %210 = arith.negf %209 : vector<2x128xf32>
    %211 = math.exp %210 : vector<2x128xf32>
    %cst_70 = arith.constant 1.000000e+00 : f32
    %212 = vector.broadcast %cst_70 : f32 to vector<2x128xf32>
    %213 = arith.addf %212, %211 : vector<2x128xf32>
    %214 = arith.divf %212, %213 : vector<2x128xf32>
    %215 = math.tanh %209 : vector<2x128xf32>
    %216 = vector.extract_strided_slice %214 {offsets = [0, 0], sizes = [2, 32], strides = [1, 1]} : vector<2x128xf32> to vector<2x32xf32>
    %217 = vector.extract_strided_slice %214 {offsets = [0, 32], sizes = [2, 32], strides = [1, 1]} : vector<2x128xf32> to vector<2x32xf32>
    %218 = vector.extract_strided_slice %214 {offsets = [0, 96], sizes = [2, 32], strides = [1, 1]} : vector<2x128xf32> to vector<2x32xf32>
    %219 = vector.extract_strided_slice %215 {offsets = [0, 64], sizes = [2, 32], strides = [1, 1]} : vector<2x128xf32> to vector<2x32xf32>
    %220 = arith.mulf %217, %174 : vector<2x32xf32>
    %221 = arith.mulf %216, %219 : vector<2x32xf32>
    %222 = arith.addf %220, %221 : vector<2x32xf32>
    %223 = math.tanh %222 : vector<2x32xf32>
    %224 = arith.mulf %218, %223 : vector<2x32xf32>
    %225 = arith.truncf %224 : vector<2x32xf32> to vector<2x32xbf16>
    %c0_71 = arith.constant 0 : index
    %c0_72 = arith.constant 0 : index
    %c0_73 = arith.constant 0 : index
    %226 = vector.load %arg3[%c0_71, %c0_72, %c0_73] : memref<1x32x128xbf16, #tpu.memory_space<vmem>>, vector<1x32x128xbf16>
    %227 = vector.shape_cast %226 : vector<1x32x128xbf16> to vector<32x128xbf16>
    %cst_74 = arith.constant dense<0.000000e+00> : vector<2x128xf32>
    %228 = tpu.matmul %225, %227, %cst_74 {dimension_numbers = #tpu.dot_dimension_numbers<[1], [0], [0], [1], [0, 0, 1, 1], [], []>} : vector<2x32xbf16>, vector<32x128xbf16>, vector<2x128xf32> -> vector<2x128xf32>
    %229 = arith.truncf %203 : vector<2x32xf32> to vector<2x32xbf16>
    %c1_75 = arith.constant 1 : index
    %c0_76 = arith.constant 0 : index
    %c0_77 = arith.constant 0 : index
    %230 = vector.load %arg2[%c1_75, %c0_76, %c0_77] : memref<2x32x128xbf16, #tpu.memory_space<vmem>>, vector<1x32x128xbf16>
    %231 = vector.shape_cast %230 : vector<1x32x128xbf16> to vector<32x128xbf16>
    %cst_78 = arith.constant dense<0.000000e+00> : vector<2x128xf32>
    %232 = tpu.matmul %229, %231, %cst_78 {dimension_numbers = #tpu.dot_dimension_numbers<[1], [0], [0], [1], [0, 0, 1, 1], [], []>} : vector<2x32xbf16>, vector<32x128xbf16>, vector<2x128xf32> -> vector<2x128xf32>
    %233 = arith.addf %228, %232 : vector<2x128xf32>
    %234 = vector.extract_strided_slice %0 {offsets = [1, 0], sizes = [1, 128], strides = [1, 1]} : vector<2x128xf32> to vector<1x128xf32>
    %235 = vector.broadcast %234 : vector<1x128xf32> to vector<2x128xf32>
    %236 = arith.addf %233, %235 : vector<2x128xf32>
    %237 = arith.negf %236 : vector<2x128xf32>
    %238 = math.exp %237 : vector<2x128xf32>
    %cst_79 = arith.constant 1.000000e+00 : f32
    %239 = vector.broadcast %cst_79 : f32 to vector<2x128xf32>
    %240 = arith.addf %239, %238 : vector<2x128xf32>
    %241 = arith.divf %239, %240 : vector<2x128xf32>
    %242 = math.tanh %236 : vector<2x128xf32>
    %243 = vector.extract_strided_slice %241 {offsets = [0, 0], sizes = [2, 32], strides = [1, 1]} : vector<2x128xf32> to vector<2x32xf32>
    %244 = vector.extract_strided_slice %241 {offsets = [0, 32], sizes = [2, 32], strides = [1, 1]} : vector<2x128xf32> to vector<2x32xf32>
    %245 = vector.extract_strided_slice %241 {offsets = [0, 96], sizes = [2, 32], strides = [1, 1]} : vector<2x128xf32> to vector<2x32xf32>
    %246 = vector.extract_strided_slice %242 {offsets = [0, 64], sizes = [2, 32], strides = [1, 1]} : vector<2x128xf32> to vector<2x32xf32>
    %247 = arith.mulf %244, %201 : vector<2x32xf32>
    %248 = arith.mulf %243, %246 : vector<2x32xf32>
    %249 = arith.addf %247, %248 : vector<2x32xf32>
    %250 = math.tanh %249 : vector<2x32xf32>
    %251 = arith.mulf %245, %250 : vector<2x32xf32>
    %252 = vector.extract_strided_slice %7 {offsets = [10, 0], sizes = [2, 128], strides = [1, 1]} : vector<16x128xf32> to vector<2x128xf32>
    %253 = arith.truncf %224 : vector<2x32xf32> to vector<2x32xbf16>
    %c0_80 = arith.constant 0 : index
    %c0_81 = arith.constant 0 : index
    %c0_82 = arith.constant 0 : index
    %254 = vector.load %arg2[%c0_80, %c0_81, %c0_82] : memref<2x32x128xbf16, #tpu.memory_space<vmem>>, vector<1x32x128xbf16>
    %255 = vector.shape_cast %254 : vector<1x32x128xbf16> to vector<32x128xbf16>
    %cst_83 = arith.constant dense<0.000000e+00> : vector<2x128xf32>
    %256 = tpu.matmul %253, %255, %cst_83 {dimension_numbers = #tpu.dot_dimension_numbers<[1], [0], [0], [1], [0, 0, 1, 1], [], []>} : vector<2x32xbf16>, vector<32x128xbf16>, vector<2x128xf32> -> vector<2x128xf32>
    %257 = arith.addf %252, %256 : vector<2x128xf32>
    %258 = arith.negf %257 : vector<2x128xf32>
    %259 = math.exp %258 : vector<2x128xf32>
    %cst_84 = arith.constant 1.000000e+00 : f32
    %260 = vector.broadcast %cst_84 : f32 to vector<2x128xf32>
    %261 = arith.addf %260, %259 : vector<2x128xf32>
    %262 = arith.divf %260, %261 : vector<2x128xf32>
    %263 = math.tanh %257 : vector<2x128xf32>
    %264 = vector.extract_strided_slice %262 {offsets = [0, 0], sizes = [2, 32], strides = [1, 1]} : vector<2x128xf32> to vector<2x32xf32>
    %265 = vector.extract_strided_slice %262 {offsets = [0, 32], sizes = [2, 32], strides = [1, 1]} : vector<2x128xf32> to vector<2x32xf32>
    %266 = vector.extract_strided_slice %262 {offsets = [0, 96], sizes = [2, 32], strides = [1, 1]} : vector<2x128xf32> to vector<2x32xf32>
    %267 = vector.extract_strided_slice %263 {offsets = [0, 64], sizes = [2, 32], strides = [1, 1]} : vector<2x128xf32> to vector<2x32xf32>
    %268 = arith.mulf %265, %222 : vector<2x32xf32>
    %269 = arith.mulf %264, %267 : vector<2x32xf32>
    %270 = arith.addf %268, %269 : vector<2x32xf32>
    %271 = math.tanh %270 : vector<2x32xf32>
    %272 = arith.mulf %266, %271 : vector<2x32xf32>
    %273 = arith.truncf %272 : vector<2x32xf32> to vector<2x32xbf16>
    %c0_85 = arith.constant 0 : index
    %c0_86 = arith.constant 0 : index
    %c0_87 = arith.constant 0 : index
    %274 = vector.load %arg3[%c0_85, %c0_86, %c0_87] : memref<1x32x128xbf16, #tpu.memory_space<vmem>>, vector<1x32x128xbf16>
    %275 = vector.shape_cast %274 : vector<1x32x128xbf16> to vector<32x128xbf16>
    %cst_88 = arith.constant dense<0.000000e+00> : vector<2x128xf32>
    %276 = tpu.matmul %273, %275, %cst_88 {dimension_numbers = #tpu.dot_dimension_numbers<[1], [0], [0], [1], [0, 0, 1, 1], [], []>} : vector<2x32xbf16>, vector<32x128xbf16>, vector<2x128xf32> -> vector<2x128xf32>
    %277 = arith.truncf %251 : vector<2x32xf32> to vector<2x32xbf16>
    %c1_89 = arith.constant 1 : index
    %c0_90 = arith.constant 0 : index
    %c0_91 = arith.constant 0 : index
    %278 = vector.load %arg2[%c1_89, %c0_90, %c0_91] : memref<2x32x128xbf16, #tpu.memory_space<vmem>>, vector<1x32x128xbf16>
    %279 = vector.shape_cast %278 : vector<1x32x128xbf16> to vector<32x128xbf16>
    %cst_92 = arith.constant dense<0.000000e+00> : vector<2x128xf32>
    %280 = tpu.matmul %277, %279, %cst_92 {dimension_numbers = #tpu.dot_dimension_numbers<[1], [0], [0], [1], [0, 0, 1, 1], [], []>} : vector<2x32xbf16>, vector<32x128xbf16>, vector<2x128xf32> -> vector<2x128xf32>
    %281 = arith.addf %276, %280 : vector<2x128xf32>
    %282 = vector.extract_strided_slice %0 {offsets = [1, 0], sizes = [1, 128], strides = [1, 1]} : vector<2x128xf32> to vector<1x128xf32>
    %283 = vector.broadcast %282 : vector<1x128xf32> to vector<2x128xf32>
    %284 = arith.addf %281, %283 : vector<2x128xf32>
    %285 = arith.negf %284 : vector<2x128xf32>
    %286 = math.exp %285 : vector<2x128xf32>
    %cst_93 = arith.constant 1.000000e+00 : f32
    %287 = vector.broadcast %cst_93 : f32 to vector<2x128xf32>
    %288 = arith.addf %287, %286 : vector<2x128xf32>
    %289 = arith.divf %287, %288 : vector<2x128xf32>
    %290 = math.tanh %284 : vector<2x128xf32>
    %291 = vector.extract_strided_slice %289 {offsets = [0, 0], sizes = [2, 32], strides = [1, 1]} : vector<2x128xf32> to vector<2x32xf32>
    %292 = vector.extract_strided_slice %289 {offsets = [0, 32], sizes = [2, 32], strides = [1, 1]} : vector<2x128xf32> to vector<2x32xf32>
    %293 = vector.extract_strided_slice %289 {offsets = [0, 96], sizes = [2, 32], strides = [1, 1]} : vector<2x128xf32> to vector<2x32xf32>
    %294 = vector.extract_strided_slice %290 {offsets = [0, 64], sizes = [2, 32], strides = [1, 1]} : vector<2x128xf32> to vector<2x32xf32>
    %295 = arith.mulf %292, %249 : vector<2x32xf32>
    %296 = arith.mulf %291, %294 : vector<2x32xf32>
    %297 = arith.addf %295, %296 : vector<2x32xf32>
    %298 = math.tanh %297 : vector<2x32xf32>
    %299 = arith.mulf %293, %298 : vector<2x32xf32>
    %300 = vector.extract_strided_slice %7 {offsets = [12, 0], sizes = [2, 128], strides = [1, 1]} : vector<16x128xf32> to vector<2x128xf32>
    %301 = arith.truncf %272 : vector<2x32xf32> to vector<2x32xbf16>
    %c0_94 = arith.constant 0 : index
    %c0_95 = arith.constant 0 : index
    %c0_96 = arith.constant 0 : index
    %302 = vector.load %arg2[%c0_94, %c0_95, %c0_96] : memref<2x32x128xbf16, #tpu.memory_space<vmem>>, vector<1x32x128xbf16>
    %303 = vector.shape_cast %302 : vector<1x32x128xbf16> to vector<32x128xbf16>
    %cst_97 = arith.constant dense<0.000000e+00> : vector<2x128xf32>
    %304 = tpu.matmul %301, %303, %cst_97 {dimension_numbers = #tpu.dot_dimension_numbers<[1], [0], [0], [1], [0, 0, 1, 1], [], []>} : vector<2x32xbf16>, vector<32x128xbf16>, vector<2x128xf32> -> vector<2x128xf32>
    %305 = arith.addf %300, %304 : vector<2x128xf32>
    %306 = arith.negf %305 : vector<2x128xf32>
    %307 = math.exp %306 : vector<2x128xf32>
    %cst_98 = arith.constant 1.000000e+00 : f32
    %308 = vector.broadcast %cst_98 : f32 to vector<2x128xf32>
    %309 = arith.addf %308, %307 : vector<2x128xf32>
    %310 = arith.divf %308, %309 : vector<2x128xf32>
    %311 = math.tanh %305 : vector<2x128xf32>
    %312 = vector.extract_strided_slice %310 {offsets = [0, 0], sizes = [2, 32], strides = [1, 1]} : vector<2x128xf32> to vector<2x32xf32>
    %313 = vector.extract_strided_slice %310 {offsets = [0, 32], sizes = [2, 32], strides = [1, 1]} : vector<2x128xf32> to vector<2x32xf32>
    %314 = vector.extract_strided_slice %310 {offsets = [0, 96], sizes = [2, 32], strides = [1, 1]} : vector<2x128xf32> to vector<2x32xf32>
    %315 = vector.extract_strided_slice %311 {offsets = [0, 64], sizes = [2, 32], strides = [1, 1]} : vector<2x128xf32> to vector<2x32xf32>
    %316 = arith.mulf %313, %270 : vector<2x32xf32>
    %317 = arith.mulf %312, %315 : vector<2x32xf32>
    %318 = arith.addf %316, %317 : vector<2x32xf32>
    %319 = math.tanh %318 : vector<2x32xf32>
    %320 = arith.mulf %314, %319 : vector<2x32xf32>
    %321 = arith.truncf %320 : vector<2x32xf32> to vector<2x32xbf16>
    %c0_99 = arith.constant 0 : index
    %c0_100 = arith.constant 0 : index
    %c0_101 = arith.constant 0 : index
    %322 = vector.load %arg3[%c0_99, %c0_100, %c0_101] : memref<1x32x128xbf16, #tpu.memory_space<vmem>>, vector<1x32x128xbf16>
    %323 = vector.shape_cast %322 : vector<1x32x128xbf16> to vector<32x128xbf16>
    %cst_102 = arith.constant dense<0.000000e+00> : vector<2x128xf32>
    %324 = tpu.matmul %321, %323, %cst_102 {dimension_numbers = #tpu.dot_dimension_numbers<[1], [0], [0], [1], [0, 0, 1, 1], [], []>} : vector<2x32xbf16>, vector<32x128xbf16>, vector<2x128xf32> -> vector<2x128xf32>
    %325 = arith.truncf %299 : vector<2x32xf32> to vector<2x32xbf16>
    %c1_103 = arith.constant 1 : index
    %c0_104 = arith.constant 0 : index
    %c0_105 = arith.constant 0 : index
    %326 = vector.load %arg2[%c1_103, %c0_104, %c0_105] : memref<2x32x128xbf16, #tpu.memory_space<vmem>>, vector<1x32x128xbf16>
    %327 = vector.shape_cast %326 : vector<1x32x128xbf16> to vector<32x128xbf16>
    %cst_106 = arith.constant dense<0.000000e+00> : vector<2x128xf32>
    %328 = tpu.matmul %325, %327, %cst_106 {dimension_numbers = #tpu.dot_dimension_numbers<[1], [0], [0], [1], [0, 0, 1, 1], [], []>} : vector<2x32xbf16>, vector<32x128xbf16>, vector<2x128xf32> -> vector<2x128xf32>
    %329 = arith.addf %324, %328 : vector<2x128xf32>
    %330 = vector.extract_strided_slice %0 {offsets = [1, 0], sizes = [1, 128], strides = [1, 1]} : vector<2x128xf32> to vector<1x128xf32>
    %331 = vector.broadcast %330 : vector<1x128xf32> to vector<2x128xf32>
    %332 = arith.addf %329, %331 : vector<2x128xf32>
    %333 = arith.negf %332 : vector<2x128xf32>
    %334 = math.exp %333 : vector<2x128xf32>
    %cst_107 = arith.constant 1.000000e+00 : f32
    %335 = vector.broadcast %cst_107 : f32 to vector<2x128xf32>
    %336 = arith.addf %335, %334 : vector<2x128xf32>
    %337 = arith.divf %335, %336 : vector<2x128xf32>
    %338 = math.tanh %332 : vector<2x128xf32>
    %339 = vector.extract_strided_slice %337 {offsets = [0, 0], sizes = [2, 32], strides = [1, 1]} : vector<2x128xf32> to vector<2x32xf32>
    %340 = vector.extract_strided_slice %337 {offsets = [0, 32], sizes = [2, 32], strides = [1, 1]} : vector<2x128xf32> to vector<2x32xf32>
    %341 = vector.extract_strided_slice %337 {offsets = [0, 96], sizes = [2, 32], strides = [1, 1]} : vector<2x128xf32> to vector<2x32xf32>
    %342 = vector.extract_strided_slice %338 {offsets = [0, 64], sizes = [2, 32], strides = [1, 1]} : vector<2x128xf32> to vector<2x32xf32>
    %343 = arith.mulf %340, %297 : vector<2x32xf32>
    %344 = arith.mulf %339, %342 : vector<2x32xf32>
    %345 = arith.addf %343, %344 : vector<2x32xf32>
    %346 = math.tanh %345 : vector<2x32xf32>
    %347 = arith.mulf %341, %346 : vector<2x32xf32>
    %348 = vector.extract_strided_slice %7 {offsets = [14, 0], sizes = [2, 128], strides = [1, 1]} : vector<16x128xf32> to vector<2x128xf32>
    %349 = arith.truncf %320 : vector<2x32xf32> to vector<2x32xbf16>
    %c0_108 = arith.constant 0 : index
    %c0_109 = arith.constant 0 : index
    %c0_110 = arith.constant 0 : index
    %350 = vector.load %arg2[%c0_108, %c0_109, %c0_110] : memref<2x32x128xbf16, #tpu.memory_space<vmem>>, vector<1x32x128xbf16>
    %351 = vector.shape_cast %350 : vector<1x32x128xbf16> to vector<32x128xbf16>
    %cst_111 = arith.constant dense<0.000000e+00> : vector<2x128xf32>
    %352 = tpu.matmul %349, %351, %cst_111 {dimension_numbers = #tpu.dot_dimension_numbers<[1], [0], [0], [1], [0, 0, 1, 1], [], []>} : vector<2x32xbf16>, vector<32x128xbf16>, vector<2x128xf32> -> vector<2x128xf32>
    %353 = arith.addf %348, %352 : vector<2x128xf32>
    %354 = arith.negf %353 : vector<2x128xf32>
    %355 = math.exp %354 : vector<2x128xf32>
    %cst_112 = arith.constant 1.000000e+00 : f32
    %356 = vector.broadcast %cst_112 : f32 to vector<2x128xf32>
    %357 = arith.addf %356, %355 : vector<2x128xf32>
    %358 = arith.divf %356, %357 : vector<2x128xf32>
    %359 = math.tanh %353 : vector<2x128xf32>
    %360 = vector.extract_strided_slice %358 {offsets = [0, 0], sizes = [2, 32], strides = [1, 1]} : vector<2x128xf32> to vector<2x32xf32>
    %361 = vector.extract_strided_slice %358 {offsets = [0, 32], sizes = [2, 32], strides = [1, 1]} : vector<2x128xf32> to vector<2x32xf32>
    %362 = vector.extract_strided_slice %358 {offsets = [0, 96], sizes = [2, 32], strides = [1, 1]} : vector<2x128xf32> to vector<2x32xf32>
    %363 = vector.extract_strided_slice %359 {offsets = [0, 64], sizes = [2, 32], strides = [1, 1]} : vector<2x128xf32> to vector<2x32xf32>
    %364 = arith.mulf %361, %318 : vector<2x32xf32>
    %365 = arith.mulf %360, %363 : vector<2x32xf32>
    %366 = arith.addf %364, %365 : vector<2x32xf32>
    %367 = math.tanh %366 : vector<2x32xf32>
    %368 = arith.mulf %362, %367 : vector<2x32xf32>
    %369 = arith.truncf %368 : vector<2x32xf32> to vector<2x32xbf16>
    %c0_113 = arith.constant 0 : index
    %c0_114 = arith.constant 0 : index
    %c0_115 = arith.constant 0 : index
    %370 = vector.load %arg3[%c0_113, %c0_114, %c0_115] : memref<1x32x128xbf16, #tpu.memory_space<vmem>>, vector<1x32x128xbf16>
    %371 = vector.shape_cast %370 : vector<1x32x128xbf16> to vector<32x128xbf16>
    %cst_116 = arith.constant dense<0.000000e+00> : vector<2x128xf32>
    %372 = tpu.matmul %369, %371, %cst_116 {dimension_numbers = #tpu.dot_dimension_numbers<[1], [0], [0], [1], [0, 0, 1, 1], [], []>} : vector<2x32xbf16>, vector<32x128xbf16>, vector<2x128xf32> -> vector<2x128xf32>
    %373 = arith.truncf %347 : vector<2x32xf32> to vector<2x32xbf16>
    %c1_117 = arith.constant 1 : index
    %c0_118 = arith.constant 0 : index
    %c0_119 = arith.constant 0 : index
    %374 = vector.load %arg2[%c1_117, %c0_118, %c0_119] : memref<2x32x128xbf16, #tpu.memory_space<vmem>>, vector<1x32x128xbf16>
    %375 = vector.shape_cast %374 : vector<1x32x128xbf16> to vector<32x128xbf16>
    %cst_120 = arith.constant dense<0.000000e+00> : vector<2x128xf32>
    %376 = tpu.matmul %373, %375, %cst_120 {dimension_numbers = #tpu.dot_dimension_numbers<[1], [0], [0], [1], [0, 0, 1, 1], [], []>} : vector<2x32xbf16>, vector<32x128xbf16>, vector<2x128xf32> -> vector<2x128xf32>
    %377 = arith.addf %372, %376 : vector<2x128xf32>
    %378 = vector.extract_strided_slice %0 {offsets = [1, 0], sizes = [1, 128], strides = [1, 1]} : vector<2x128xf32> to vector<1x128xf32>
    %379 = vector.broadcast %378 : vector<1x128xf32> to vector<2x128xf32>
    %380 = arith.addf %377, %379 : vector<2x128xf32>
    %381 = arith.negf %380 : vector<2x128xf32>
    %382 = math.exp %381 : vector<2x128xf32>
    %cst_121 = arith.constant 1.000000e+00 : f32
    %383 = vector.broadcast %cst_121 : f32 to vector<2x128xf32>
    %384 = arith.addf %383, %382 : vector<2x128xf32>
    %385 = arith.divf %383, %384 : vector<2x128xf32>
    %386 = math.tanh %380 : vector<2x128xf32>
    %387 = vector.extract_strided_slice %385 {offsets = [0, 0], sizes = [2, 32], strides = [1, 1]} : vector<2x128xf32> to vector<2x32xf32>
    %388 = vector.extract_strided_slice %385 {offsets = [0, 32], sizes = [2, 32], strides = [1, 1]} : vector<2x128xf32> to vector<2x32xf32>
    %389 = vector.extract_strided_slice %385 {offsets = [0, 96], sizes = [2, 32], strides = [1, 1]} : vector<2x128xf32> to vector<2x32xf32>
    %390 = vector.extract_strided_slice %386 {offsets = [0, 64], sizes = [2, 32], strides = [1, 1]} : vector<2x128xf32> to vector<2x32xf32>
    %391 = arith.mulf %388, %345 : vector<2x32xf32>
    %392 = arith.mulf %387, %390 : vector<2x32xf32>
    %393 = arith.addf %391, %392 : vector<2x32xf32>
    %394 = math.tanh %393 : vector<2x32xf32>
    %395 = arith.mulf %389, %394 : vector<2x32xf32>
    %396 = arith.truncf %395 : vector<2x32xf32> to vector<2x32xbf16>
    %c0_122 = arith.constant 0 : index
    %c0_123 = arith.constant 0 : index
    %397 = vector.load %arg5[%c0_122, %c0_123] : memref<32x32xbf16, #tpu.memory_space<vmem>>, vector<32x32xbf16>
    %cst_124 = arith.constant dense<0.000000e+00> : vector<2x32xf32>
    %398 = tpu.matmul %396, %397, %cst_124 {dimension_numbers = #tpu.dot_dimension_numbers<[1], [0], [0], [1], [0, 0, 1, 1], [], []>} : vector<2x32xbf16>, vector<32x32xbf16>, vector<2x32xf32> -> vector<2x32xf32>
    %399 = vector.extract_strided_slice %1 {offsets = [0, 0], sizes = [1, 32], strides = [1, 1]} : vector<1x67xf32> to vector<1x32xf32>
    %400 = vector.broadcast %399 : vector<1x32xf32> to vector<2x32xf32>
    %401 = arith.addf %398, %400 : vector<2x32xf32>
    %cst_125 = arith.constant 0.000000e+00 : f32
    %402 = vector.broadcast %cst_125 : f32 to vector<2x32xf32>
    %403 = arith.maximumf %401, %402 : vector<2x32xf32>
    %404 = arith.truncf %403 : vector<2x32xf32> to vector<2x32xbf16>
    %c0_126 = arith.constant 0 : index
    %c0_127 = arith.constant 0 : index
    %405 = vector.load %arg6[%c0_126, %c0_127] : memref<32x35xbf16, #tpu.memory_space<vmem>>, vector<32x35xbf16>
    %cst_128 = arith.constant dense<0.000000e+00> : vector<2x35xf32>
    %406 = tpu.matmul %404, %405, %cst_128 {dimension_numbers = #tpu.dot_dimension_numbers<[1], [0], [0], [1], [0, 0, 1, 1], [], []>} : vector<2x32xbf16>, vector<32x35xbf16>, vector<2x35xf32> -> vector<2x35xf32>
    %407 = vector.extract_strided_slice %1 {offsets = [0, 32], sizes = [1, 35], strides = [1, 1]} : vector<1x67xf32> to vector<1x35xf32>
    %408 = vector.broadcast %407 : vector<1x35xf32> to vector<2x35xf32>
    %409 = arith.addf %406, %408 : vector<2x35xf32>
    %410 = vector.extract_strided_slice %409 {offsets = [0, 0], sizes = [2, 15], strides = [1, 1]} : vector<2x35xf32> to vector<2x15xf32>
    %c0_129 = arith.constant 0 : index
    %c0_130 = arith.constant 0 : index
    %411 = vector.load %arg8[%c0_129, %c0_130] : memref<2x15xf32, #tpu.memory_space<vmem>>, vector<2x15xf32>
    tpu.vector_store %arg8[%c0_129, %c0_130], %410 {strides = array<i32>} : memref<2x15xf32, #tpu.memory_space<vmem>>, vector<2x15xf32>,
    %412 = vector.extract_strided_slice %409 {offsets = [0, 15], sizes = [2, 15], strides = [1, 1]} : vector<2x35xf32> to vector<2x15xf32>
    %413 = math.exp %412 : vector<2x15xf32>
    %cst_131 = arith.constant 9.99999997E-7 : f32
    %414 = vector.broadcast %cst_131 : f32 to vector<2x15xf32>
    %415 = arith.maximumf %413, %414 : vector<2x15xf32>
    %c0_132 = arith.constant 0 : index
    %c0_133 = arith.constant 0 : index
    %416 = vector.load %arg9[%c0_132, %c0_133] : memref<2x15xf32, #tpu.memory_space<vmem>>, vector<2x15xf32>
    tpu.vector_store %arg9[%c0_132, %c0_133], %415 {strides = array<i32>} : memref<2x15xf32, #tpu.memory_space<vmem>>, vector<2x15xf32>,
    %417 = vector.extract_strided_slice %409 {offsets = [0, 30], sizes = [2, 5], strides = [1, 1]} : vector<2x35xf32> to vector<2x5xf32>
    %cst_134 = arith.constant dense<0xFF800000> : vector<2xf32>
    %418 = vector.multi_reduction <maximumf>, %417, %cst_134 [1] : vector<2x5xf32> to vector<2xf32>
    %419 = vector.shape_cast %418 : vector<2xf32> to vector<2x1xf32>
    %420 = vector.broadcast %419 : vector<2x1xf32> to vector<2x5xf32>
    %421 = arith.subf %417, %420 : vector<2x5xf32>
    %422 = math.exp %421 : vector<2x5xf32>
    %cst_135 = arith.constant dense<0.000000e+00> : vector<2xf32>
    %423 = vector.multi_reduction <add>, %422, %cst_135 [1] : vector<2x5xf32> to vector<2xf32>
    %424 = vector.shape_cast %423 : vector<2xf32> to vector<2x1xf32>
    %425 = tpu.reciprocal %424 {approx = true} : vector<2x1xf32> -> vector<2x1xf32>
    %426 = vector.broadcast %425 : vector<2x1xf32> to vector<2x5xf32>
    %427 = arith.mulf %422, %426 : vector<2x5xf32>
    %c0_136 = arith.constant 0 : index
    %c0_137 = arith.constant 0 : index
    %428 = vector.load %arg10[%c0_136, %c0_137] : memref<2x5xf32, #tpu.memory_space<vmem>>, vector<2x5xf32>
    tpu.vector_store %arg10[%c0_136, %c0_137], %427 {strides = array<i32>} : memref<2x5xf32, #tpu.memory_space<vmem>>, vector<2x5xf32>,
    return
  }
}

</mosaic_0001>

<bundles_post_ra>
// kernel: lstm_mdn_forward.1
= control target key start
LH: loop header
LB: loop body
LE: loop exit
PB: predicated region body
PF: predicated region fallthrough
CT: control target
= control target key end

     0   :  { %16 = vsyncpa [#allocation3], 0  ;;  %s3077_s0 = inlined_call_operand.vmem [shape: bf16[16,16], index: 0, kind: input, shape index: {}]   ;;  %s3078_s1 = inlined_call_operand.hbm [shape: bf16[16,128], index: 1, kind: input, shape index: {}]   ;;  %s3079_s2 = inlined_call_operand.vmem [shape: bf16[2,32,128], index: 2, kind: input, shape index: {}]   ;;  %s3080_s3 = inlined_call_operand.vmem [shape: bf16[1,32,128], index: 3, kind: input, shape index: {}]   ;;  %s3081_s4 = inlined_call_operand.vmem [shape: f32[2,128], index: 4, kind: input, shape index: {}]   ;;  %s3082_s5 = inlined_call_operand.hbm [shape: bf16[32,32], index: 5, kind: input, shape index: {}]   ;;  %s3083_s6 = inlined_call_operand.hbm [shape: bf16[32,35], index: 6, kind: input, shape index: {}]   ;;  %s3084_s7 = inlined_call_operand.hbm [shape: f32[1,67], index: 7, kind: input, shape index: {}]   ;;  %s3085_s8 = inlined_call_operand.hbm [shape: f32[2,15], index: 8, kind: output, shape index: {0}]   ;;  %s3086_s9 = inlined_call_operand.hbm [shape: f32[2,15], index: 9, kind: output, shape index: {1}]   ;;  %s3087_s10 = inlined_call_operand.hbm [shape: f32[2,5], index: 10, kind: output, shape index: {2}]  }
   0x1   :  { %17 = vsyncpa [#allocation6], 0 }
   0x2   :  { %18 = vsyncpa [#allocation9], 0 }
   0x3   :  { %19 = vsyncpa [#allocation4], 0 }
   0x4   :  { %20 = vsyncpa [#allocation12], 0  ;;  %s2600_s13 = smov [#allocation5]   ;;  %s2601_s15 = smov [#allocation2]  }
   0x5   :  { %s46_s14 = sshll.u32 %s2600_s13, 4  ;;  %s28_s16 = sshll.u32 %s2601_s15, 4  ;;  %s47_s14 = int_to_ptr.vmem [resolvable:$true] %s46_s14  ;;  %s29_s16 = int_to_ptr.vmem [resolvable:$true] %s28_s16 }
   0x6   :  { %s2458_s17 = scalar_lea.vmem %s47_s14, 256  ;;  %p2463_p1 = scmp.lt.s32.totalorder %s47_s14, %s47_s14 }
   0x7   :  { %p2459_p0 = scmp.ne.s32.totalorder %s47_s14, %s2458_s17  ;;  %p2464_p2 = scmp.lt.s32.totalorder %s2458_s17, %s2458_s17 }
   0x9   :  { %p2465_p3 = por %p2464_p2, %p2463_p1 }
   0xb   :  { %p2466_p4 = pnand %p2465_p3, %p2459_p0 }
   0xd   :  { %2469 = shalt.err (!%p2466_p4)
}
   0xe   :  { %s2602_s18 = smov 64   ;;  %s2603_s19 = smov 4  }
   0xf   :  { %52 = dma.hbm_to_vmem [thread:$0]  %s3082_s5, 256, %s47_s14, [#allocation6], %s2602_s18, %s2602_s18, %s2603_s19  }
  0x10   :  { %s2478_s22 = scalar_lea.vmem %s29_s16, 128  ;;  %p2483_p6 = scmp.lt.s32.totalorder %s29_s16, %s29_s16 }
  0x11   :  { %p2479_p5 = scmp.ne.s32.totalorder %s29_s16, %s2478_s22  ;;  %p2484_p7 = scmp.lt.s32.totalorder %s2478_s22, %s2478_s22 }
  0x13   :  { %p2485_p8 = por %p2484_p7, %p2483_p6 }
  0x15   :  { %p2486_p9 = pnand %p2485_p8, %p2479_p5 }
  0x17   :  { %2489 = shalt.err (!%p2486_p9)
}
  0x18   :  { %34 = dma.hbm_to_vmem [thread:$0]  %s3078_s1, 128, %s29_s16, [#allocation3], %s2602_s18, %s2602_s18, %s2603_s19  }
  0x19   :  { %s2604_s25 = smov [#allocation7]   ;;  %s2605_s27 = smov [#allocation8]  }
  0x1a   :  { %s58_s26 = sshll.u32 %s2604_s25, 4  ;;  %s71_s28 = sshll.u32 %s2605_s27, 4  ;;  %s59_s26 = int_to_ptr.vmem [resolvable:$true] %s58_s26  ;;  %s72_s28 = int_to_ptr.vmem [resolvable:$true] %s71_s28 }
  0x1b   :  { %s2498_s5 = scalar_lea.vmem %s59_s26, 256  ;;  %p2503_p11 = scmp.lt.s32.totalorder %s59_s26, %s59_s26 }
  0x1c   :  { %p2499_p10 = scmp.ne.s32.totalorder %s59_s26, %s2498_s5  ;;  %p2504_p12 = scmp.lt.s32.totalorder %s2498_s5, %s2498_s5 }
  0x1e   :  { %p2505_p13 = por %p2504_p12, %p2503_p11 }
  0x20   :  { %p2506_p0 = pnand %p2505_p13, %p2499_p10 }
  0x22   :  { %2509 = shalt.err (!%p2506_p0)
}
  0x23   :  { %64 = dma.hbm_to_vmem [thread:$0]  %s3083_s6, 256, %s59_s26, [#allocation6], %s2602_s18, %s2602_s18, %s2603_s19  }
  0x24   :  { %s2518_s1 = scalar_lea.vmem %s72_s28, 16  ;;  %s2522_s11 = scalar_lea.vmem %s72_s28, 32 }
  0x25   :  { %p2519_p1 = scmp.ne.s32.totalorder %s72_s28, %s2518_s1  ;;  %p2523_p2 = scmp.lt.s32.totalorder %s72_s28, %s72_s28 }
  0x26   :  { %p2524_p3 = scmp.lt.s32.totalorder %s2522_s11, %s2518_s1 }
  0x28   :  { %p2525_p4 = por %p2524_p3, %p2523_p2 }
  0x2a   :  { %p2526_p5 = pnand %p2525_p4, %p2519_p1 }
  0x2c   :  { %2529 = shalt.err (!%p2526_p5)
}
  0x2d   :  { %74 = dma.hbm_to_vmem [thread:$0]  %s3084_s7, 16, %s72_s28, [#allocation9]  }
  0x2e   :  { %2590 = dma.done.wait [#allocation3], 128  }
  0x2f   :  { %2591 = vsyncadd [#allocation3], 4294967168 }
  0x30   :  { %2592 = dma.done.wait [#allocation6], 512  }
  0x31   :  { %2593 = vsyncadd [#allocation6], 4294966784 }
  0x32   :  { %2594 = dma.done.wait [#allocation9], 16  }
  0x33   :  { %2595 = vsyncadd [#allocation9], 4294967280  ;;  %v2606_v0 = vmov 0.0   ;;  %vm2607_vm0 = vmmov 0   ;;  %v2298_v1 = vld [vmem:[#allocation2] sm:$0xff]   ;;  %v2698_v2 = vld [vmem:[%s3079_s2 + $0x8] sm:$0xff]   ;;  %v94_v6 = vlaneseq }
  0x34   :  { %2068 = vmatprep.subr.bf16.mxu0 %v2606_v0  ;;  %2074 = vmatprep.subr.bf16.mxu1 %v2606_v0  ;;  %v2300_v3 = vld [vmem:[%s3077_s0] sm:$0xff]   ;;  %vm109_vm1 = vcmask 130048   ;;  %v2608_v5 = vmov 0   ;;  %v2739_v32 = vld [vmem:[%s3079_s2 + $0x18] sm:$0xff]   ;;  %v2744_v33 = vld [vmem:[%s3080_s3 + $0x8] sm:$0xff]   ;;  %vm170_vm2 = vcmask 261120  }
  0x35   :  { %2070 = vmatprep.mubr.msk.bf16.mxu0 %vm2607_vm0, %v2606_v0  ;;  %2078 = vmatprep.mubr.msk.bf16.mxu1 %vm2607_vm0, %v2606_v0  ;;  %v2707_v4 = vld [vmem:[%s3079_s2] sm:$0xff]   ;;  %v2717_v7 = vshrl.u32 %v94_v6, 7  ;;  %v2750_v34 = vld [vmem:[%s3079_s2 + $0x10] sm:$0xff]   ;;  %vm1864_vm3 = vcmask 279792   ;;  %vm1854_vm4 = vcmask 115712   ;;  %vm1875_vm5 = vcmask 33792  }
  0x36   :  { %2069 = vmatpush3.bf16.msra.mxu0 %v2298_v1  ;;  %2075 = vmatpush3.bf16.msra.mxu1 %v2698_v2  ;;  %v2723_v9 = vld [vmem:[%s3081_s4] sm:$0x3]  ;;  %s2609_s4 = smov 32   ;;  %s2613_s16 = smov [#allocation11]  }
  0x37   :  { %2082 = vmatprep.subr.bf16.mxu0 %v2606_v0  ;;  %2076 = vmatprep.subr.bf16.mxu1 %v2606_v0  ;;  %v96_v8 = vsub.s32 0, %v2717_v7  ;;  %v2756_v35 = vld [vmem:[%s3080_s3] sm:$0xff]   ;;  %v361_v45 = vsub.s32 1, %v2717_v7  ;;  %s1902_s17 = sshll.u32 %s2613_s16, 4  ;;  %s2614_s0 = smov [#allocation10]   ;;  %s1903_s17 = int_to_ptr.vmem [resolvable:$true] %s1902_s17 }
  0x38   :  { %s1892_s19 = sshll.u32 %s2614_s0, 4  ;;  %p2535_p7 = scmp.lt.s32.totalorder %s1903_s17, %s1903_s17  ;;  %s1893_s19 = int_to_ptr.vmem [resolvable:$true] %s1892_s19 }
  0x39   :  { %2071 = vmatmul.mubr.msk.bf16.vlgmr.msra.gmra.mxu0 %vm109_vm1, %v2300_v3  ;;  %v97_v10 = vrot.slane %v2723_v9, %v96_v8  ;;  %v2788_v46 = vrot.slane %v2723_v9, %v361_v45 }
  0x3a   :  { %2086 = vmatprep.mubr.msk.bf16.mxu0 %vm2607_vm0, %v2606_v0  ;;  %2077 = vmatpush3.bf16.msra.mxu1 %v2707_v4 }
  0x3b   :  { %2090 = vmatprep.subr.bf16.mxu1 %v2606_v0  ;;  %2083 = vmatpush3.bf16.msra.mxu0 %v2739_v32 }
  0x3c   :  { %2084 = vmatprep.subr.bf16.mxu0 %v2606_v0 }
  0x3d   :  { %2079 = vmatmul.mubr.bf16.vlgmr.msra.gmra.mxu1 %v2608_v5 }
  0x3e   :  { %2094 = vmatprep.mubr.msk.bf16.mxu1 %vm2607_vm0, %v2606_v0  ;;  %2091 = vmatpush3.bf16.msra.mxu1 %v2744_v33 }
  0x3f   :  { %2092 = vmatprep.subr.bf16.mxu1 %v2606_v0  ;;  %2085 = vmatpush3.bf16.msra.mxu0 %v2750_v34 }
  0x40   :  { %2098 = vmatprep.subr.bf16.mxu0 %v2606_v0 }
  0x42   :  { %2093 = vmatpush3.bf16.msra.mxu1 %v2756_v35  ;;  %2087 = vmatmul.mubr.bf16.vlgmr.msra.gmra.mxu0 %v2608_v5 }
  0x43   :  { %2106 = vmatprep.subr.bf16.mxu1 %v2606_v0  ;;  %2099 = vmatpush3.bf16.msra.mxu0 %v2698_v2 }
  0x44   :  { %2102 = vmatprep.mubr.msk.bf16.mxu0 %vm2607_vm0, %v2606_v0  ;;  %2100 = vmatprep.subr.bf16.mxu0 %v2606_v0 }
  0x47   :  { %2101 = vmatpush3.bf16.msra.mxu0 %v2707_v4 }
  0x48   :  { %2114 = vmatprep.subr.bf16.mxu0 %v2606_v0 }
  0xf9   :  { %v147_v11 = vpop.f32.mrf.mxu0 }
  0xfa   :  { %v2726_v12 = vadd.f32 %v147_v11, %v97_v10 }
  0xfb   :  { %v2072_v13 = vpop.f32.mrf.mxu0 }
  0xfd   :  { %v150_v14 = vpop.f32.mrf.mxu0  ;;  %v208_v16 = vpop.f32.mrf.mxu1 }
  0xfe   :  { %v2728_v15 = vadd.f32 %v150_v14, %v97_v10  ;;  %v214_v17 = vadd.f32 %v208_v16, %v2726_v12 }
  0xff   :  { %v2073_v18 = vpop.f32.mrf.mxu0  ;;  %v2080_v19 = vpop.f32.mrf.mxu1 }
 0x100   :  { %2310 = vtanh.f32 %v214_v17  ;;  %v1935_v23 = vmul.f32 -1.442695, %v214_v17 }
 0x101   :  { %v211_v20 = vpop.f32.mrf.mxu1 }
 0x102   :  { %2312 = vpow2.f32 %v1935_v23  ;;  %v295_v40 = vpop.f32.mrf.mxu0 }
 0x103   :  { %v2081_v21 = vpop.f32.mrf.mxu1 }
 0x104   :  { %v2088_v41 = vpop.f32.mrf.mxu0 }
 0x106   :  { %v298_v42 = vpop.f32.mrf.mxu0 }
 0x108   :  { %v2089_v43 = vpop.f32.mrf.mxu0 }
 0x10d   :  { %v2311_v22 = vpop.eup %2310 }
 0x10e   :  { %224 = vrot.lane.b32.xlu0 %v2311_v22, %s2602_s18 }
 0x10f   :  { %v2313_v24 = vpop.eup %2312 }
 0x110   :  { %v218_v25 = vadd.f32 1.0, %v2313_v24 }
 0x112   :  { %2314 = vrcp.f32 %v218_v25 }
 0x11f   :  { %v2315_v26 = vpop.eup %2314 }
 0x120   :  { %v222_v29 = vmul.f32 0.0, %v2315_v26 }
 0x180   :  { %v225_v27 = vpop.permute.xlu0 %224 }
 0x181   :  { %v227_v28 = vmul.f32 %v2315_v26, %v225_v27 }
 0x183   :  { %229 = vrot.lane.b32.xlu0 %v227_v28, %s2609_s4 }
 0x1f5   :  { %v230_v30 = vpop.permute.xlu0 %229 }
 0x1f6   :  { %v2733_v31 = vadd.f32 %v230_v30, %v222_v29 }
 0x1f8   :  { %2316 = vtanh.f32 %v2733_v31  ;;  %v440_v13 = vrot.slane %v2733_v31, 6 }
 0x205   :  { %v2317_v36 = vpop.eup %2316 }
 0x206   :  { %235 = vrot.lane.b32.xlu1 %v2317_v36, %s2602_s18 }
 0x278   :  { %v236_v37 = vpop.permute.xlu1 %235 }
 0x279   :  { %v238_v38 = vmul.f32 %v2315_v26, %v236_v37 }
 0x27b   :  { %v239_v39 = vpack.c.bf16 %v238_v38, %v238_v38 }
 0x27d   :  { %302 = vrot.lane.b32.xlu1 %v239_v39, %s2609_s4 }
 0x2ef   :  { %v303_v44 = vpop.permute.xlu1 %302 }
 0x2f0   :  { %2095 = vmatmul.mubr.msk.bf16.vlgmr.msra.gmra.mxu1 %vm170_vm2, %v303_v44  ;;  %2103 = vmatmul.mubr.msk.bf16.vlgmr.msra.gmra.mxu0 %vm170_vm2, %v303_v44 }
 0x2f1   :  { %2107 = vmatpush3.bf16.msra.mxu1 %v2739_v32  ;;  %2115 = vmatpush3.bf16.msra.mxu0 %v2744_v33 }
 0x2f2   :  { %2108 = vmatprep.subr.bf16.mxu1 %v2606_v0  ;;  %2116 = vmatprep.subr.bf16.mxu0 %v2606_v0 }
 0x2f3   :  { %2110 = vmatprep.mubr.msk.bf16.mxu1 %vm2607_vm0, %v2606_v0  ;;  %2118 = vmatprep.mubr.msk.bf16.mxu0 %vm2607_vm0, %v2606_v0 }
 0x2f5   :  { %2109 = vmatpush3.bf16.msra.mxu1 %v2750_v34  ;;  %2117 = vmatpush3.bf16.msra.mxu0 %v2756_v35 }
 0x2f6   :  { %2122 = vmatprep.subr.bf16.mxu1 %v2606_v0  ;;  %2130 = vmatprep.subr.bf16.mxu0 %v2606_v0 }
 0x3b0   :  { %v353_v47 = vpop.f32.mrf.mxu1  ;;  %v422_v48 = vpop.f32.mrf.mxu0 }
 0x3b1   :  { %v354_v49 = vadd.f32 %v353_v47, %v295_v40  ;;  %v429_v50 = vrot.slane %v422_v48, 6 }
 0x3b2   :  { %v2096_v51 = vpop.f32.mrf.mxu1  ;;  %v2104_v52 = vpop.f32.mrf.mxu0 }
 0x3b3   :  { %v363_v53 = vadd.f32 %v2788_v46, %v354_v49  ;;  %v431_v54 = vadd.f32 %v429_v50, %v2726_v12 }
 0x3b4   :  { %v356_v55 = vpop.f32.mrf.mxu1  ;;  %v425_v56 = vpop.f32.mrf.mxu0 }
 0x3b5   :  { %2318 = vtanh.f32 %v363_v53  ;;  %v1945_v61 = vmul.f32 -1.442695, %v363_v53  ;;  %v1947_v62 = vmul.f32 -1.442695, %v431_v54 }
 0x3b6   :  { %2320 = vtanh.f32 %v431_v54  ;;  %v2097_v57 = vpop.f32.mrf.mxu1  ;;  %v2105_v58 = vpop.f32.mrf.mxu0 }
 0x3b7   :  { %2322 = vpow2.f32 %v1945_v61 }
 0x3b8   :  { %2324 = vpow2.f32 %v1947_v62 }
 0x3c2   :  { %v2319_v59 = vpop.eup %2318 }
 0x3c3   :  { %v2321_v60 = vpop.eup %2320  ;;  %373 = vrot.lane.b32.xlu0 %v2319_v59, %s2602_s18 }
 0x3c4   :  { %444 = vrot.lane.b32.xlu1 %v2321_v60, %s2602_s18  ;;  %v2323_v63 = vpop.eup %2322 }
 0x3c5   :  { %v2325_v1 = vpop.eup %2324  ;;  %v367_v3 = vadd.f32 1.0, %v2323_v63 }
 0x3c6   :  { %v435_v5 = vadd.f32 1.0, %v2325_v1 }
 0x3c7   :  { %2326 = vrcp.f32 %v367_v3 }
 0x3c8   :  { %2328 = vrcp.f32 %v435_v5 }
 0x3d4   :  { %v2327_v6 = vpop.eup %2326 }
 0x3d5   :  { %v2329_v8 = vpop.eup %2328  ;;  %v371_v14 = vmul.f32 0.0, %v2327_v6 }
 0x3d6   :  { %v442_v16 = vmul.f32 %v2329_v8, %v440_v13 }
 0x435   :  { %v374_v7 = vpop.permute.xlu0 %373 }
 0x436   :  { %v445_v9 = vpop.permute.xlu1 %444  ;;  %v376_v10 = vmul.f32 %v2327_v6, %v374_v7 }
 0x437   :  { %v447_v11 = vmul.f32 %v2329_v8, %v445_v9 }
 0x438   :  { %378 = vrot.lane.b32.xlu0 %v376_v10, %s2609_s4 }
 0x439   :  { %449 = vrot.lane.b32.xlu1 %v447_v11, %s2609_s4 }
 0x4aa   :  { %v379_v17 = vpop.permute.xlu0 %378 }
 0x4ab   :  { %v450_v18 = vpop.permute.xlu1 %449  ;;  %v2797_v19 = vadd.f32 %v379_v17, %v371_v14 }
 0x4ac   :  { %v2799_v20 = vadd.f32 %v450_v18, %v442_v16 }
 0x4ad   :  { %2330 = vtanh.f32 %v2797_v19 }
 0x4ae   :  { %2332 = vtanh.f32 %v2799_v20  ;;  %v631_v9 = vrot.slane %v2799_v20, 6 }
 0x4ba   :  { %v2331_v21 = vpop.eup %2330 }
 0x4bb   :  { %v2333_v22 = vpop.eup %2332  ;;  %384 = vrot.lane.b32.xlu0 %v2331_v21, %s2602_s18 }
 0x4bc   :  { %455 = vrot.lane.b32.xlu1 %v2333_v22, %s2602_s18 }
 0x52d   :  { %v385_v23 = vpop.permute.xlu0 %384 }
 0x52e   :  { %v456_v24 = vpop.permute.xlu1 %455  ;;  %v387_v25 = vmul.f32 %v2327_v6, %v385_v23 }
 0x52f   :  { %v458_v26 = vmul.f32 %v2329_v8, %v456_v24 }
 0x530   :  { %v460_v27 = vpack.c.bf16 %v387_v25, %v387_v25 }
 0x531   :  { %v459_v28 = vpack.c.bf16 %v458_v26, %v458_v26 }
 0x532   :  { %462 = vrot.lane.b32.xlu0 %v460_v27, %s2609_s4 }
 0x533   :  { %v508_v29 = vrot.slane %v459_v28, 1 }
 0x535   :  { %509 = vrot.lane.b32.xlu1 %v508_v29, %s2609_s4 }
 0x5a4   :  { %v463_v30 = vpop.permute.xlu0 %462 }
 0x5a5   :  { %2111 = vmatmul.mubr.msk.bf16.vlgmr.msra.gmra.mxu1 %vm170_vm2, %v463_v30 }
 0x5a6   :  { %2123 = vmatpush3.bf16.msra.mxu1 %v2698_v2  ;;  %2126 = vmatprep.mubr.msk.bf16.mxu1 %vm2607_vm0, %v2606_v0 }
 0x5a7   :  { %v510_v31 = vpop.permute.xlu1 %509  ;;  %2124 = vmatprep.subr.bf16.mxu1 %v2606_v0 }
 0x5a8   :  { %2119 = vmatmul.mubr.msk.bf16.vlgmr.msra.gmra.mxu0 %vm170_vm2, %v510_v31 }
 0x5a9   :  { %2131 = vmatpush3.bf16.msra.mxu0 %v2739_v32  ;;  %2134 = vmatprep.mubr.msk.bf16.mxu0 %vm2607_vm0, %v2606_v0 }
 0x5aa   :  { %2125 = vmatpush3.bf16.msra.mxu1 %v2707_v4  ;;  %2132 = vmatprep.subr.bf16.mxu0 %v2606_v0 }
 0x5ab   :  { %2138 = vmatprep.subr.bf16.mxu1 %v2606_v0 }
 0x5ad   :  { %2127 = vmatmul.mubr.msk.bf16.vlgmr.msra.gmra.mxu1 %vm170_vm2, %v510_v31  ;;  %2133 = vmatpush3.bf16.msra.mxu0 %v2750_v34 }
 0x5ae   :  { %2146 = vmatprep.subr.bf16.mxu0 %v2606_v0  ;;  %2139 = vmatpush3.bf16.msra.mxu1 %v2744_v33 }
 0x5af   :  { %2140 = vmatprep.subr.bf16.mxu1 %v2606_v0  ;;  %2142 = vmatprep.mubr.msk.bf16.mxu1 %vm2607_vm0, %v2606_v0 }
 0x5b2   :  { %2141 = vmatpush3.bf16.msra.mxu1 %v2756_v35 }
 0x5b3   :  { %2154 = vmatprep.subr.bf16.mxu1 %v2606_v0 }
 0x665   :  { %v501_v36 = vpop.f32.mrf.mxu1 }
 0x667   :  { %v2112_v37 = vpop.f32.mrf.mxu1 }
 0x668   :  { %v548_v38 = vpop.f32.mrf.mxu0 }
 0x669   :  { %v549_v39 = vadd.f32 %v548_v38, %v501_v36  ;;  %v504_v40 = vpop.f32.mrf.mxu1 }
 0x66a   :  { %v2120_v41 = vpop.f32.mrf.mxu0 }
 0x66b   :  { %v554_v42 = vadd.f32 %v549_v39, %v2788_v46  ;;  %v2113_v43 = vpop.f32.mrf.mxu1 }
 0x66c   :  { %v551_v44 = vpop.f32.mrf.mxu0 }
 0x66d   :  { %2334 = vtanh.f32 %v554_v42  ;;  %v613_v45 = vpop.f32.mrf.mxu1  ;;  %v1950_v55 = vmul.f32 -1.442695, %v554_v42 }
 0x66e   :  { %v2121_v47 = vpop.f32.mrf.mxu0  ;;  %v620_v48 = vrot.slane %v613_v45, 4 }
 0x66f   :  { %v2128_v49 = vpop.f32.mrf.mxu1 }
 0x670   :  { %v622_v50 = vadd.f32 %v620_v48, %v2726_v12 }
 0x671   :  { %v616_v51 = vpop.f32.mrf.mxu1 }
 0x672   :  { %2336 = vtanh.f32 %v622_v50  ;;  %v1952_v56 = vmul.f32 -1.442695, %v622_v50 }
 0x673   :  { %v2129_v52 = vpop.f32.mrf.mxu1  ;;  %2338 = vpow2.f32 %v1950_v55 }
 0x674   :  { %2340 = vpow2.f32 %v1952_v56 }
 0x67a   :  { %v2335_v53 = vpop.eup %2334 }
 0x67b   :  { %564 = vrot.lane.b32.xlu0 %v2335_v53, %s2602_s18 }
 0x67f   :  { %v2337_v54 = vpop.eup %2336 }
 0x680   :  { %635 = vrot.lane.b32.xlu1 %v2337_v54, %s2602_s18  ;;  %v2339_v57 = vpop.eup %2338 }
 0x681   :  { %v558_v58 = vadd.f32 1.0, %v2339_v57  ;;  %v2341_v59 = vpop.eup %2340 }
 0x682   :  { %v626_v60 = vadd.f32 1.0, %v2341_v59 }
 0x683   :  { %2342 = vrcp.f32 %v558_v58 }
 0x684   :  { %2344 = vrcp.f32 %v626_v60 }
 0x690   :  { %v2343_v61 = vpop.eup %2342 }
 0x691   :  { %v2345_v1 = vpop.eup %2344  ;;  %v562_v6 = vmul.f32 %v2343_v61, %v2797_v19 }
 0x692   :  { %v633_v10 = vmul.f32 %v2345_v1, %v631_v9 }
 0x6ed   :  { %v565_v62 = vpop.permute.xlu0 %564 }
 0x6ee   :  { %v567_v63 = vmul.f32 %v2343_v61, %v565_v62 }
 0x6f0   :  { %569 = vrot.lane.b32.xlu0 %v567_v63, %s2609_s4 }
 0x6f2   :  { %v636_v3 = vpop.permute.xlu1 %635 }
 0x6f3   :  { %v638_v5 = vmul.f32 %v2345_v1, %v636_v3 }
 0x6f5   :  { %640 = vrot.lane.b32.xlu1 %v638_v5, %s2609_s4 }
 0x762   :  { %v570_v7 = vpop.permute.xlu0 %569 }
 0x763   :  { %v2835_v8 = vadd.f32 %v570_v7, %v562_v6 }
 0x765   :  { %2346 = vtanh.f32 %v2835_v8 }
 0x767   :  { %v641_v11 = vpop.permute.xlu1 %640 }
 0x768   :  { %v2839_v13 = vadd.f32 %v641_v11, %v633_v10 }
 0x76a   :  { %2348 = vtanh.f32 %v2839_v13  ;;  %v822_v60 = vrot.slane %v2839_v13, 6 }
 0x772   :  { %v2347_v14 = vpop.eup %2346 }
 0x773   :  { %575 = vrot.lane.b32.xlu0 %v2347_v14, %s2602_s18 }
 0x777   :  { %v2349_v16 = vpop.eup %2348 }
 0x778   :  { %646 = vrot.lane.b32.xlu1 %v2349_v16, %s2602_s18 }
 0x7e5   :  { %v576_v17 = vpop.permute.xlu0 %575 }
 0x7e6   :  { %v578_v18 = vmul.f32 %v2343_v61, %v576_v17 }
 0x7e8   :  { %v651_v19 = vpack.c.bf16 %v578_v18, %v578_v18 }
 0x7ea   :  { %653 = vrot.lane.b32.xlu0 %v651_v19, %s2609_s4  ;;  %v647_v20 = vpop.permute.xlu1 %646 }
 0x7eb   :  { %v649_v21 = vmul.f32 %v2345_v1, %v647_v20 }
 0x7ed   :  { %v650_v22 = vpack.c.bf16 %v649_v21, %v649_v21 }
 0x7ef   :  { %v699_v23 = vrot.slane %v650_v22, 2 }
 0x7f1   :  { %700 = vrot.lane.b32.xlu1 %v699_v23, %s2609_s4 }
 0x85c   :  { %v654_v24 = vpop.permute.xlu0 %653 }
 0x85d   :  { %2135 = vmatmul.mubr.msk.bf16.vlgmr.msra.gmra.mxu0 %vm170_vm2, %v654_v24 }
 0x85e   :  { %2147 = vmatpush3.bf16.msra.mxu0 %v2698_v2  ;;  %2150 = vmatprep.mubr.msk.bf16.mxu0 %vm2607_vm0, %v2606_v0 }
 0x85f   :  { %2148 = vmatprep.subr.bf16.mxu0 %v2606_v0 }
 0x862   :  { %2149 = vmatpush3.bf16.msra.mxu0 %v2707_v4 }
 0x863   :  { %v701_v25 = vpop.permute.xlu1 %700  ;;  %2162 = vmatprep.subr.bf16.mxu0 %v2606_v0 }
 0x864   :  { %2143 = vmatmul.mubr.msk.bf16.vlgmr.msra.gmra.mxu1 %vm170_vm2, %v701_v25 }
 0x865   :  { %2151 = vmatmul.mubr.msk.bf16.vlgmr.msra.gmra.mxu0 %vm170_vm2, %v701_v25  ;;  %2155 = vmatpush3.bf16.msra.mxu1 %v2739_v32 }
 0x866   :  { %2163 = vmatpush3.bf16.msra.mxu0 %v2744_v33  ;;  %2156 = vmatprep.subr.bf16.mxu1 %v2606_v0 }
 0x867   :  { %2164 = vmatprep.subr.bf16.mxu0 %v2606_v0  ;;  %2158 = vmatprep.mubr.msk.bf16.mxu1 %vm2607_vm0, %v2606_v0 }
 0x868   :  { %2166 = vmatprep.mubr.msk.bf16.mxu0 %vm2607_vm0, %v2606_v0 }
 0x869   :  { %2157 = vmatpush3.bf16.msra.mxu1 %v2750_v34 }
 0x86a   :  { %2165 = vmatpush3.bf16.msra.mxu0 %v2756_v35  ;;  %2170 = vmatprep.subr.bf16.mxu1 %v2606_v0 }
 0x86b   :  { %2178 = vmatprep.subr.bf16.mxu0 %v2606_v0 }
 0x91d   :  { %v692_v26 = vpop.f32.mrf.mxu0 }
 0x91f   :  { %v2136_v27 = vpop.f32.mrf.mxu0 }
 0x921   :  { %v695_v28 = vpop.f32.mrf.mxu0 }
 0x923   :  { %v2137_v29 = vpop.f32.mrf.mxu0 }
 0x924   :  { %v739_v30 = vpop.f32.mrf.mxu1 }
 0x925   :  { %v740_v31 = vadd.f32 %v739_v30, %v692_v26  ;;  %v804_v36 = vpop.f32.mrf.mxu0 }
 0x926   :  { %v811_v37 = vrot.slane %v804_v36, 2  ;;  %v2144_v38 = vpop.f32.mrf.mxu1 }
 0x927   :  { %v745_v39 = vadd.f32 %v740_v31, %v2788_v46  ;;  %v2152_v40 = vpop.f32.mrf.mxu0 }
 0x928   :  { %v813_v41 = vadd.f32 %v811_v37, %v2726_v12  ;;  %v742_v42 = vpop.f32.mrf.mxu1 }
 0x929   :  { %2350 = vtanh.f32 %v745_v39  ;;  %v807_v43 = vpop.f32.mrf.mxu0  ;;  %v1955_v49 = vmul.f32 -1.442695, %v745_v39 }
 0x92a   :  { %2352 = vtanh.f32 %v813_v41  ;;  %v2145_v44 = vpop.f32.mrf.mxu1  ;;  %v1957_v50 = vmul.f32 -1.442695, %v813_v41 }
 0x92b   :  { %v2153_v45 = vpop.f32.mrf.mxu0  ;;  %2354 = vpow2.f32 %v1955_v49 }
 0x92c   :  { %2356 = vpow2.f32 %v1957_v50 }
 0x936   :  { %v2351_v47 = vpop.eup %2350 }
 0x937   :  { %v2353_v48 = vpop.eup %2352  ;;  %755 = vrot.lane.b32.xlu1 %v2351_v47, %s2602_s18 }
 0x938   :  { %826 = vrot.lane.b32.xlu0 %v2353_v48, %s2602_s18  ;;  %v2355_v51 = vpop.eup %2354 }
 0x939   :  { %v2357_v52 = vpop.eup %2356  ;;  %v749_v53 = vadd.f32 1.0, %v2355_v51 }
 0x93a   :  { %v817_v12 = vadd.f32 1.0, %v2357_v52 }
 0x93b   :  { %2358 = vrcp.f32 %v749_v53 }
 0x93c   :  { %2360 = vrcp.f32 %v817_v12 }
 0x948   :  { %v2359_v54 = vpop.eup %2358 }
 0x949   :  { %v2361_v56 = vpop.eup %2360  ;;  %v753_v61 = vmul.f32 %v2359_v54, %v2835_v8 }
 0x94a   :  { %v824_v62 = vmul.f32 %v2361_v56, %v822_v60 }
 0x9a9   :  { %v756_v55 = vpop.permute.xlu1 %755 }
 0x9aa   :  { %v827_v57 = vpop.permute.xlu0 %826  ;;  %v758_v58 = vmul.f32 %v2359_v54, %v756_v55 }
 0x9ab   :  { %v829_v59 = vmul.f32 %v2361_v56, %v827_v57 }
 0x9ac   :  { %760 = vrot.lane.b32.xlu1 %v758_v58, %s2609_s4 }
 0x9ad   :  { %831 = vrot.lane.b32.xlu0 %v829_v59, %s2609_s4 }
 0xa1e   :  { %v761_v63 = vpop.permute.xlu1 %760 }
 0xa1f   :  { %v832_v1 = vpop.permute.xlu0 %831  ;;  %v2875_v3 = vadd.f32 %v761_v63, %v753_v61 }
 0xa20   :  { %v2877_v5 = vadd.f32 %v832_v1, %v824_v62 }
 0xa21   :  { %2362 = vtanh.f32 %v2875_v3 }
 0xa22   :  { %2364 = vtanh.f32 %v2877_v5  ;;  %v1010_v12 = vrot.slane %v2877_v5, 6 }
 0xa2e   :  { %v2363_v6 = vpop.eup %2362 }
 0xa2f   :  { %v2365_v7 = vpop.eup %2364  ;;  %766 = vrot.lane.b32.xlu1 %v2363_v6, %s2602_s18 }
 0xa30   :  { %837 = vrot.lane.b32.xlu0 %v2365_v7, %s2602_s18 }
 0xaa1   :  { %v767_v9 = vpop.permute.xlu1 %766 }
 0xaa2   :  { %v838_v10 = vpop.permute.xlu0 %837  ;;  %v769_v8 = vmul.f32 %v2359_v54, %v767_v9 }
 0xaa3   :  { %v840_v11 = vmul.f32 %v2361_v56, %v838_v10 }
 0xaa4   :  { %v842_v13 = vpack.c.bf16 %v769_v8, %v769_v8 }
 0xaa5   :  { %v841_v14 = vpack.c.bf16 %v840_v11, %v840_v11 }
 0xaa6   :  { %844 = vrot.lane.b32.xlu0 %v842_v13, %s2609_s4 }
 0xaa7   :  { %v890_v16 = vrot.slane %v841_v14, 3 }
 0xaa9   :  { %891 = vrot.lane.b32.xlu1 %v890_v16, %s2609_s4 }
 0xb18   :  { %v845_v17 = vpop.permute.xlu0 %844 }
 0xb19   :  { %2159 = vmatmul.mubr.msk.bf16.vlgmr.msra.gmra.mxu1 %vm170_vm2, %v845_v17 }
 0xb1a   :  { %2171 = vmatpush3.bf16.msra.mxu1 %v2698_v2  ;;  %2174 = vmatprep.mubr.msk.bf16.mxu1 %vm2607_vm0, %v2606_v0 }
 0xb1b   :  { %v892_v18 = vpop.permute.xlu1 %891  ;;  %2172 = vmatprep.subr.bf16.mxu1 %v2606_v0 }
 0xb1c   :  { %2167 = vmatmul.mubr.msk.bf16.vlgmr.msra.gmra.mxu0 %vm170_vm2, %v892_v18 }
 0xb1d   :  { %2179 = vmatpush3.bf16.msra.mxu0 %v2739_v32  ;;  %2182 = vmatprep.mubr.msk.bf16.mxu0 %vm2607_vm0, %v2606_v0 }
 0xb1e   :  { %2173 = vmatpush3.bf16.msra.mxu1 %v2707_v4  ;;  %2180 = vmatprep.subr.bf16.mxu0 %v2606_v0 }
 0xb1f   :  { %2186 = vmatprep.subr.bf16.mxu1 %v2606_v0 }
 0xb21   :  { %2175 = vmatmul.mubr.msk.bf16.vlgmr.msra.gmra.mxu1 %vm170_vm2, %v892_v18  ;;  %2181 = vmatpush3.bf16.msra.mxu0 %v2750_v34 }
 0xb22   :  { %2187 = vmatpush3.bf16.msra.mxu1 %v2744_v33  ;;  %2194 = vmatprep.subr.bf16.mxu0 %v2606_v0 }
 0xb23   :  { %2188 = vmatprep.subr.bf16.mxu1 %v2606_v0  ;;  %2190 = vmatprep.mubr.msk.bf16.mxu1 %vm2607_vm0, %v2606_v0 }
 0xb26   :  { %2189 = vmatpush3.bf16.msra.mxu1 %v2756_v35 }
 0xb27   :  { %2202 = vmatprep.subr.bf16.mxu1 %v2606_v0 }
 0xbd9   :  { %v883_v19 = vpop.f32.mrf.mxu1 }
 0xbdb   :  { %v2160_v20 = vpop.f32.mrf.mxu1 }
 0xbdc   :  { %v930_v21 = vpop.f32.mrf.mxu0 }
 0xbdd   :  { %v931_v22 = vadd.f32 %v930_v21, %v883_v19  ;;  %v886_v23 = vpop.f32.mrf.mxu1 }
 0xbde   :  { %v2168_v24 = vpop.f32.mrf.mxu0 }
 0xbdf   :  { %v936_v25 = vadd.f32 %v931_v22, %v2788_v46  ;;  %v2161_v26 = vpop.f32.mrf.mxu1 }
 0xbe0   :  { %v933_v27 = vpop.f32.mrf.mxu0 }
 0xbe1   :  { %2366 = vtanh.f32 %v936_v25  ;;  %v995_v28 = vpop.f32.mrf.mxu1  ;;  %v1960_v40 = vmul.f32 -1.442695, %v936_v25 }
 0xbe2   :  { %v2169_v29 = vpop.f32.mrf.mxu0  ;;  %v1001_v30 = vadd.f32 %v995_v28, %v2728_v15 }
 0xbe3   :  { %v2176_v31 = vpop.f32.mrf.mxu1 }
 0xbe4   :  { %2368 = vtanh.f32 %v1001_v30  ;;  %v1962_v41 = vmul.f32 -1.442695, %v1001_v30 }
 0xbe5   :  { %v998_v36 = vpop.f32.mrf.mxu1  ;;  %2370 = vpow2.f32 %v1960_v40 }
 0xbe6   :  { %2372 = vpow2.f32 %v1962_v41 }
 0xbe7   :  { %v2177_v37 = vpop.f32.mrf.mxu1 }
 0xbee   :  { %v2367_v38 = vpop.eup %2366 }
 0xbef   :  { %946 = vrot.lane.b32.xlu0 %v2367_v38, %s2602_s18 }
 0xbf1   :  { %v2369_v39 = vpop.eup %2368 }
 0xbf2   :  { %1014 = vrot.lane.b32.xlu1 %v2369_v39, %s2602_s18  ;;  %v2371_v42 = vpop.eup %2370 }
 0xbf3   :  { %v2373_v43 = vpop.eup %2372  ;;  %v940_v44 = vadd.f32 1.0, %v2371_v42 }
 0xbf4   :  { %v1005_v45 = vadd.f32 1.0, %v2373_v43 }
 0xbf5   :  { %2374 = vrcp.f32 %v940_v44 }
 0xbf6   :  { %2376 = vrcp.f32 %v1005_v45 }
 0xc02   :  { %v2375_v47 = vpop.eup %2374 }
 0xc03   :  { %v2377_v50 = vpop.eup %2376  ;;  %v944_v53 = vmul.f32 %v2375_v47, %v2875_v3 }
 0xc04   :  { %v1012_v56 = vmul.f32 %v2377_v50, %v1010_v12 }
 0xc61   :  { %v947_v48 = vpop.permute.xlu0 %946 }
 0xc62   :  { %v949_v49 = vmul.f32 %v2375_v47, %v947_v48 }
 0xc64   :  { %951 = vrot.lane.b32.xlu0 %v949_v49, %s2609_s4  ;;  %v1015_v51 = vpop.permute.xlu1 %1014 }
 0xc65   :  { %v1017_v52 = vmul.f32 %v2377_v50, %v1015_v51 }
 0xc67   :  { %1019 = vrot.lane.b32.xlu1 %v1017_v52, %s2609_s4 }
 0xcd6   :  { %v952_v54 = vpop.permute.xlu0 %951 }
 0xcd7   :  { %v2914_v55 = vadd.f32 %v952_v54, %v944_v53 }
 0xcd9   :  { %2378 = vtanh.f32 %v2914_v55  ;;  %v1020_v57 = vpop.permute.xlu1 %1019 }
 0xcda   :  { %v2917_v58 = vadd.f32 %v1020_v57, %v1012_v56 }
 0xcdc   :  { %2380 = vtanh.f32 %v2917_v58  ;;  %v1200_v48 = vrot.slane %v2917_v58, 6 }
 0xce6   :  { %v2379_v59 = vpop.eup %2378 }
 0xce7   :  { %957 = vrot.lane.b32.xlu0 %v2379_v59, %s2602_s18 }
 0xce9   :  { %v2381_v60 = vpop.eup %2380 }
 0xcea   :  { %1025 = vrot.lane.b32.xlu1 %v2381_v60, %s2602_s18 }
 0xd59   :  { %v958_v61 = vpop.permute.xlu0 %957 }
 0xd5a   :  { %v960_v62 = vmul.f32 %v2375_v47, %v958_v61 }
 0xd5c   :  { %v1030_v63 = vpack.c.bf16 %v960_v62, %v960_v62  ;;  %v1026_v1 = vpop.permute.xlu1 %1025 }
 0xd5d   :  { %v1028_v3 = vmul.f32 %v2377_v50, %v1026_v1 }
 0xd5e   :  { %1032 = vrot.lane.b32.xlu0 %v1030_v63, %s2609_s4 }
 0xd5f   :  { %v1029_v5 = vpack.c.bf16 %v1028_v3, %v1028_v3 }
 0xd61   :  { %1078 = vrot.lane.b32.xlu1 %v1029_v5, %s2609_s4 }
 0xdd0   :  { %v1033_v6 = vpop.permute.xlu0 %1032 }
 0xdd1   :  { %2183 = vmatmul.mubr.msk.bf16.vlgmr.msra.gmra.mxu0 %vm170_vm2, %v1033_v6 }
 0xdd2   :  { %2195 = vmatpush3.bf16.msra.mxu0 %v2698_v2  ;;  %2198 = vmatprep.mubr.msk.bf16.mxu0 %vm2607_vm0, %v2606_v0 }
 0xdd3   :  { %2196 = vmatprep.subr.bf16.mxu0 %v2606_v0  ;;  %v1079_v7 = vpop.permute.xlu1 %1078 }
 0xdd4   :  { %2191 = vmatmul.mubr.msk.bf16.vlgmr.msra.gmra.mxu1 %vm170_vm2, %v1079_v7 }
 0xdd5   :  { %2203 = vmatpush3.bf16.msra.mxu1 %v2739_v32  ;;  %2206 = vmatprep.mubr.msk.bf16.mxu1 %vm2607_vm0, %v2606_v0 }
 0xdd6   :  { %2197 = vmatpush3.bf16.msra.mxu0 %v2707_v4  ;;  %2204 = vmatprep.subr.bf16.mxu1 %v2606_v0 }
 0xdd7   :  { %2210 = vmatprep.subr.bf16.mxu0 %v2606_v0 }
 0xdd9   :  { %2199 = vmatmul.mubr.msk.bf16.vlgmr.msra.gmra.mxu0 %vm170_vm2, %v1079_v7  ;;  %2205 = vmatpush3.bf16.msra.mxu1 %v2750_v34 }
 0xdda   :  { %2211 = vmatpush3.bf16.msra.mxu0 %v2744_v33  ;;  %2218 = vmatprep.subr.bf16.mxu1 %v2606_v0 }
 0xddb   :  { %2212 = vmatprep.subr.bf16.mxu0 %v2606_v0  ;;  %2214 = vmatprep.mubr.msk.bf16.mxu0 %vm2607_vm0, %v2606_v0 }
 0xdde   :  { %2213 = vmatpush3.bf16.msra.mxu0 %v2756_v35 }
 0xddf   :  { %2226 = vmatprep.subr.bf16.mxu0 %v2606_v0 }
 0xe91   :  { %v1071_v9 = vpop.f32.mrf.mxu0 }
 0xe93   :  { %v2184_v10 = vpop.f32.mrf.mxu0 }
 0xe94   :  { %v1117_v8 = vpop.f32.mrf.mxu1 }
 0xe95   :  { %v1074_v11 = vpop.f32.mrf.mxu0  ;;  %v1118_v13 = vadd.f32 %v1117_v8, %v1071_v9 }
 0xe96   :  { %v2192_v14 = vpop.f32.mrf.mxu1 }
 0xe97   :  { %v1123_v16 = vadd.f32 %v1118_v13, %v2788_v46  ;;  %v2185_v17 = vpop.f32.mrf.mxu0 }
 0xe98   :  { %v1120_v18 = vpop.f32.mrf.mxu1 }
 0xe99   :  { %2382 = vtanh.f32 %v1123_v16  ;;  %v1182_v19 = vpop.f32.mrf.mxu0  ;;  %v1965_v28 = vmul.f32 -1.442695, %v1123_v16 }
 0xe9a   :  { %v1189_v20 = vrot.slane %v1182_v19, 6  ;;  %v2193_v21 = vpop.f32.mrf.mxu1 }
 0xe9b   :  { %v2200_v22 = vpop.f32.mrf.mxu0 }
 0xe9c   :  { %v1191_v23 = vadd.f32 %v1189_v20, %v2728_v15 }
 0xe9d   :  { %v1185_v24 = vpop.f32.mrf.mxu0 }
 0xe9e   :  { %2384 = vtanh.f32 %v1191_v23  ;;  %v1967_v29 = vmul.f32 -1.442695, %v1191_v23 }
 0xe9f   :  { %v2201_v25 = vpop.f32.mrf.mxu0  ;;  %2386 = vpow2.f32 %v1965_v28 }
 0xea0   :  { %2388 = vpow2.f32 %v1967_v29 }
 0xea6   :  { %v2383_v26 = vpop.eup %2382 }
 0xea7   :  { %1133 = vrot.lane.b32.xlu0 %v2383_v26, %s2602_s18 }
 0xeab   :  { %v2385_v27 = vpop.eup %2384 }
 0xeac   :  { %1204 = vrot.lane.b32.xlu1 %v2385_v27, %s2602_s18  ;;  %v2387_v30 = vpop.eup %2386 }
 0xead   :  { %v1127_v31 = vadd.f32 1.0, %v2387_v30  ;;  %v2389_v36 = vpop.eup %2388 }
 0xeae   :  { %v1195_v37 = vadd.f32 1.0, %v2389_v36 }
 0xeaf   :  { %2390 = vrcp.f32 %v1127_v31 }
 0xeb0   :  { %2392 = vrcp.f32 %v1195_v37 }
 0xebc   :  { %v2391_v38 = vpop.eup %2390 }
 0xebd   :  { %v2393_v41 = vpop.eup %2392  ;;  %v1131_v44 = vmul.f32 %v2391_v38, %v2914_v55 }
 0xebe   :  { %v1202_v49 = vmul.f32 %v2393_v41, %v1200_v48 }
 0xf19   :  { %v1134_v39 = vpop.permute.xlu0 %1133 }
 0xf1a   :  { %v1136_v40 = vmul.f32 %v2391_v38, %v1134_v39 }
 0xf1c   :  { %1138 = vrot.lane.b32.xlu0 %v1136_v40, %s2609_s4 }
 0xf1e   :  { %v1205_v42 = vpop.permute.xlu1 %1204 }
 0xf1f   :  { %v1207_v43 = vmul.f32 %v2393_v41, %v1205_v42 }
 0xf21   :  { %1209 = vrot.lane.b32.xlu1 %v1207_v43, %s2609_s4 }
 0xf8e   :  { %v1139_v45 = vpop.permute.xlu0 %1138 }
 0xf8f   :  { %v2952_v47 = vadd.f32 %v1139_v45, %v1131_v44 }
 0xf91   :  { %2394 = vtanh.f32 %v2952_v47 }
 0xf93   :  { %v1210_v50 = vpop.permute.xlu1 %1209 }
 0xf94   :  { %v2956_v51 = vadd.f32 %v1210_v50, %v1202_v49  ;;  %v2444_v49 = vld [vmem:[%s3079_s2 + $0x8] sm:$0xff]  }
 0xf96   :  { %2396 = vtanh.f32 %v2956_v51  ;;  %v1391_v27 = vrot.slane %v2956_v51, 6  ;;  %v2445_v51 = vld [vmem:[%s3079_s2 + $0x18] sm:$0xff]  }
 0xf9e   :  { %v2395_v52 = vpop.eup %2394 }
 0xf9f   :  { %1144 = vrot.lane.b32.xlu0 %v2395_v52, %s2602_s18  ;;  %v2446_v52 = vld [vmem:[%s3079_s2] sm:$0xff]  }
 0xfa3   :  { %v2397_v53 = vpop.eup %2396 }
 0xfa4   :  { %1215 = vrot.lane.b32.xlu1 %v2397_v53, %s2602_s18  ;;  %v2447_v53 = vld [vmem:[%s3079_s2 + $0x10] sm:$0xff]   ;;  %s2610_s2 = smov 96  }
0x1011   :  { %v1145_v12 = vpop.permute.xlu0 %1144 }
0x1012   :  { %v1147_v54 = vmul.f32 %v2391_v38, %v1145_v12  ;;  %v2448_v12 = vld [vmem:[%s3080_s3 + $0x8] sm:$0xff]  }
0x1014   :  { %v1220_v55 = vpack.c.bf16 %v1147_v54, %v1147_v54  ;;  %v2449_v54 = vld [vmem:[%s3080_s3] sm:$0xff]   ;;  %s2611_s3 = smov 113  }
0x1016   :  { %v1216_v56 = vpop.permute.xlu1 %1215  ;;  %1222 = vrot.lane.b32.xlu0 %v1220_v55, %s2609_s4 }
0x1017   :  { %v1218_v57 = vmul.f32 %v2393_v41, %v1216_v56 }
0x1019   :  { %v1219_v58 = vpack.c.bf16 %v1218_v57, %v1218_v57 }
0x101b   :  { %v1268_v59 = vrot.slane %v1219_v58, 1 }
0x101d   :  { %1269 = vrot.lane.b32.xlu1 %v1268_v59, %s2609_s4 }
0x1088   :  { %v1223_v60 = vpop.permute.xlu0 %1222 }
0x1089   :  { %2207 = vmatmul.mubr.msk.bf16.vlgmr.msra.gmra.mxu1 %vm170_vm2, %v1223_v60 }
0x108a   :  { %2219 = vmatpush3.bf16.msra.mxu1 %v2698_v2  ;;  %2222 = vmatprep.mubr.msk.bf16.mxu1 %vm2607_vm0, %v2606_v0 }
0x108b   :  { %2220 = vmatprep.subr.bf16.mxu1 %v2606_v0 }
0x108e   :  { %2221 = vmatpush3.bf16.msra.mxu1 %v2707_v4 }
0x108f   :  { %v1270_v61 = vpop.permute.xlu1 %1269  ;;  %2234 = vmatprep.subr.bf16.mxu1 %v2606_v0 }
0x1090   :  { %2215 = vmatmul.mubr.msk.bf16.vlgmr.msra.gmra.mxu0 %vm170_vm2, %v1270_v61 }
0x1091   :  { %2223 = vmatmul.mubr.msk.bf16.vlgmr.msra.gmra.mxu1 %vm170_vm2, %v1270_v61  ;;  %2227 = vmatpush3.bf16.msra.mxu0 %v2739_v32 }
0x1092   :  { %2228 = vmatprep.subr.bf16.mxu0 %v2606_v0  ;;  %2235 = vmatpush3.bf16.msra.mxu1 %v2744_v33 }
0x1093   :  { %2230 = vmatprep.mubr.msk.bf16.mxu0 %vm2607_vm0, %v2606_v0  ;;  %2236 = vmatprep.subr.bf16.mxu1 %v2606_v0 }
0x1094   :  { %2238 = vmatprep.mubr.msk.bf16.mxu1 %vm2607_vm0, %v2606_v0 }
0x1095   :  { %2229 = vmatpush3.bf16.msra.mxu0 %v2750_v34 }
0x1096   :  { %2242 = vmatprep.subr.bf16.mxu0 %v2606_v0  ;;  %2237 = vmatpush3.bf16.msra.mxu1 %v2756_v35 }
0x1097   :  { %2250 = vmatprep.subr.bf16.mxu1 %v2606_v0 }
0x1149   :  { %v1261_v2 = vpop.f32.mrf.mxu1 }
0x114b   :  { %v2208_v4 = vpop.f32.mrf.mxu1 }
0x114d   :  { %v1264_v32 = vpop.f32.mrf.mxu1 }
0x114f   :  { %v2209_v33 = vpop.f32.mrf.mxu1 }
0x1150   :  { %v1308_v62 = vpop.f32.mrf.mxu0 }
0x1151   :  { %v1309_v63 = vadd.f32 %v1308_v62, %v1261_v2  ;;  %v1373_v1 = vpop.f32.mrf.mxu1 }
0x1152   :  { %v2216_v3 = vpop.f32.mrf.mxu0  ;;  %v1380_v5 = vrot.slane %v1373_v1, 4 }
0x1153   :  { %v1314_v6 = vadd.f32 %v1309_v63, %v2788_v46  ;;  %v2224_v7 = vpop.f32.mrf.mxu1 }
0x1154   :  { %v1382_v34 = vadd.f32 %v1380_v5, %v2728_v15  ;;  %v1311_v9 = vpop.f32.mrf.mxu0 }
0x1155   :  { %2398 = vtanh.f32 %v1314_v6  ;;  %v1376_v10 = vpop.f32.mrf.mxu1  ;;  %v1970_v14 = vmul.f32 -1.442695, %v1314_v6 }
0x1156   :  { %2400 = vtanh.f32 %v1382_v34  ;;  %v2217_v35 = vpop.f32.mrf.mxu0  ;;  %v1972_v16 = vmul.f32 -1.442695, %v1382_v34 }
0x1157   :  { %v2225_v8 = vpop.f32.mrf.mxu1  ;;  %2402 = vpow2.f32 %v1970_v14 }
0x1158   :  { %2404 = vpow2.f32 %v1972_v16 }
0x1162   :  { %v2399_v11 = vpop.eup %2398 }
0x1163   :  { %v2401_v13 = vpop.eup %2400  ;;  %1324 = vrot.lane.b32.xlu0 %v2399_v11, %s2602_s18 }
0x1164   :  { %1395 = vrot.lane.b32.xlu1 %v2401_v13, %s2602_s18  ;;  %v2403_v17 = vpop.eup %2402 }
0x1165   :  { %v2405_v18 = vpop.eup %2404  ;;  %v1318_v19 = vadd.f32 1.0, %v2403_v17 }
0x1166   :  { %v1386_v20 = vadd.f32 1.0, %v2405_v18 }
0x1167   :  { %2406 = vrcp.f32 %v1318_v19 }
0x1168   :  { %2408 = vrcp.f32 %v1386_v20 }
0x1174   :  { %v2407_v21 = vpop.eup %2406 }
0x1175   :  { %v2409_v23 = vpop.eup %2408  ;;  %v1322_v28 = vmul.f32 %v2407_v21, %v2952_v47 }
0x1176   :  { %v1393_v30 = vmul.f32 %v2409_v23, %v1391_v27 }
0x11d5   :  { %v1325_v22 = vpop.permute.xlu0 %1324 }
0x11d6   :  { %v1327_v24 = vmul.f32 %v2407_v21, %v1325_v22  ;;  %v1396_v25 = vpop.permute.xlu1 %1395 }
0x11d7   :  { %v1398_v26 = vmul.f32 %v2409_v23, %v1396_v25 }
0x11d8   :  { %1329 = vrot.lane.b32.xlu0 %v1327_v24, %s2609_s4 }
0x11d9   :  { %1400 = vrot.lane.b32.xlu1 %v1398_v26, %s2609_s4 }
0x124a   :  { %v1330_v29 = vpop.permute.xlu0 %1329 }
0x124b   :  { %v2992_v31 = vadd.f32 %v1330_v29, %v1322_v28  ;;  %v1401_v36 = vpop.permute.xlu1 %1400 }
0x124c   :  { %v2994_v37 = vadd.f32 %v1401_v36, %v1393_v30 }
0x124d   :  { %2410 = vtanh.f32 %v2992_v31 }
0x124e   :  { %2412 = vtanh.f32 %v2994_v37  ;;  %v1582_v22 = vrot.slane %v2994_v37, 6 }
0x125a   :  { %v2411_v38 = vpop.eup %2410 }
0x125b   :  { %v2413_v39 = vpop.eup %2412  ;;  %1335 = vrot.lane.b32.xlu0 %v2411_v38, %s2602_s18 }
0x125c   :  { %1406 = vrot.lane.b32.xlu1 %v2413_v39, %s2602_s18 }
0x12cd   :  { %v1336_v40 = vpop.permute.xlu0 %1335 }
0x12ce   :  { %v1338_v41 = vmul.f32 %v2407_v21, %v1336_v40  ;;  %v1407_v42 = vpop.permute.xlu1 %1406 }
0x12cf   :  { %v1409_v43 = vmul.f32 %v2409_v23, %v1407_v42 }
0x12d0   :  { %v1411_v44 = vpack.c.bf16 %v1338_v41, %v1338_v41 }
0x12d1   :  { %v1410_v45 = vpack.c.bf16 %v1409_v43, %v1409_v43 }
0x12d2   :  { %1413 = vrot.lane.b32.xlu0 %v1411_v44, %s2609_s4 }
0x12d3   :  { %v1459_v47 = vrot.slane %v1410_v45, 2 }
0x12d5   :  { %1460 = vrot.lane.b32.xlu1 %v1459_v47, %s2609_s4 }
0x1344   :  { %v1414_v48 = vpop.permute.xlu0 %1413 }
0x1345   :  { %2231 = vmatmul.mubr.msk.bf16.vlgmr.msra.gmra.mxu0 %vm170_vm2, %v1414_v48 }
0x1346   :  { %2243 = vmatpush3.bf16.msra.mxu0 %v2444_v49  ;;  %2246 = vmatprep.mubr.msk.bf16.mxu0 %vm2607_vm0, %v2606_v0 }
0x1347   :  { %2244 = vmatprep.subr.bf16.mxu0 %v2606_v0  ;;  %v1461_v50 = vpop.permute.xlu1 %1460 }
0x1348   :  { %2239 = vmatmul.mubr.msk.bf16.vlgmr.msra.gmra.mxu1 %vm170_vm2, %v1461_v50 }
0x1349   :  { %2251 = vmatpush3.bf16.msra.mxu1 %v2445_v51  ;;  %2254 = vmatprep.mubr.msk.bf16.mxu1 %vm2607_vm0, %v2606_v0 }
0x134a   :  { %2245 = vmatpush3.bf16.msra.mxu0 %v2446_v52  ;;  %2252 = vmatprep.subr.bf16.mxu1 %v2606_v0 }
0x134b   :  { %2258 = vmatprep.subr.bf16.mxu0 %v2606_v0 }
0x134d   :  { %2247 = vmatmul.mubr.msk.bf16.vlgmr.msra.gmra.mxu0 %vm170_vm2, %v1461_v50  ;;  %2253 = vmatpush3.bf16.msra.mxu1 %v2447_v53 }
0x134e   :  { %2259 = vmatpush3.bf16.msra.mxu0 %v2448_v12  ;;  %2262 = vmatprep.mubr.msk.bf16.mxu0 %vm2607_vm0, %v2606_v0 }
0x134f   :  { %2260 = vmatprep.subr.bf16.mxu0 %v2606_v0  ;;  %2266 = vmatprep.subr.bf16.mxu1 %v2606_v0 }
0x1352   :  { %2261 = vmatpush3.bf16.msra.mxu0 %v2449_v54 }
0x1353   :  { %2274 = vmatprep.subr.bf16.mxu0 %v2606_v0 }
0x1405   :  { %v1452_v55 = vpop.f32.mrf.mxu0 }
0x1407   :  { %v2232_v56 = vpop.f32.mrf.mxu0 }
0x1408   :  { %v1499_v57 = vpop.f32.mrf.mxu1 }
0x1409   :  { %v1455_v58 = vpop.f32.mrf.mxu0  ;;  %v1500_v59 = vadd.f32 %v1499_v57, %v1452_v55 }
0x140a   :  { %v2240_v60 = vpop.f32.mrf.mxu1 }
0x140b   :  { %v1505_v61 = vadd.f32 %v1500_v59, %v2788_v46  ;;  %v2233_v2 = vpop.f32.mrf.mxu0 }
0x140c   :  { %v1502_v4 = vpop.f32.mrf.mxu1 }
0x140d   :  { %2414 = vtanh.f32 %v1505_v61  ;;  %v1564_v32 = vpop.f32.mrf.mxu0  ;;  %v1975_v34 = vmul.f32 -1.442695, %v1505_v61  ;;  %v2307_v61 = vld [vmem:[#allocation5] sm:$0xff]   ;;  %v2308_v4 = vld [vmem:[#allocation7 + $0x8] sm:$0xff]  }
0x140e   :  { %v1571_v33 = vrot.slane %v1564_v32, 2  ;;  %v2241_v62 = vpop.f32.mrf.mxu1 }
0x140f   :  { %v2248_v63 = vpop.f32.mrf.mxu0 }
0x1410   :  { %v1573_v1 = vadd.f32 %v1571_v33, %v2728_v15 }
0x1411   :  { %v1567_v3 = vpop.f32.mrf.mxu0 }
0x1412   :  { %2416 = vtanh.f32 %v1573_v1  ;;  %v1977_v9 = vmul.f32 -1.442695, %v1573_v1  ;;  %v2309_v1 = vld [vmem:[#allocation7] sm:$0xff]   ;;  %v1981_v3 = vld [vmem:[#allocation8] ss:$0 sm:$0xff] }
0x1413   :  { %v2249_v5 = vpop.f32.mrf.mxu0  ;;  %2418 = vpow2.f32 %v1975_v34 }
0x1414   :  { %2420 = vpow2.f32 %v1977_v9 }
0x141a   :  { %v2415_v6 = vpop.eup %2414 }
0x141b   :  { %1515 = vrot.lane.b32.xlu1 %v2415_v6, %s2602_s18 }
0x141f   :  { %v2417_v7 = vpop.eup %2416 }
0x1420   :  { %1586 = vrot.lane.b32.xlu0 %v2417_v7, %s2602_s18  ;;  %v2419_v10 = vpop.eup %2418 }
0x1421   :  { %v1509_v35 = vadd.f32 1.0, %v2419_v10  ;;  %v2421_v8 = vpop.eup %2420 }
0x1422   :  { %v1577_v11 = vadd.f32 1.0, %v2421_v8 }
0x1423   :  { %2422 = vrcp.f32 %v1509_v35 }
0x1424   :  { %2424 = vrcp.f32 %v1577_v11 }
0x1430   :  { %v2423_v15 = vpop.eup %2422 }
0x1431   :  { %v2425_v16 = vpop.eup %2424  ;;  %v1513_v19 = vmul.f32 %v2423_v15, %v2992_v31 }
0x1432   :  { %v1584_v23 = vmul.f32 %v2425_v16, %v1582_v22 }
0x148d   :  { %v1516_v13 = vpop.permute.xlu1 %1515 }
0x148e   :  { %v1518_v14 = vmul.f32 %v2423_v15, %v1516_v13 }
0x1490   :  { %1520 = vrot.lane.b32.xlu1 %v1518_v14, %s2609_s4 }
0x1492   :  { %v1587_v17 = vpop.permute.xlu0 %1586 }
0x1493   :  { %v1589_v18 = vmul.f32 %v2425_v16, %v1587_v17 }
0x1495   :  { %1591 = vrot.lane.b32.xlu0 %v1589_v18, %s2609_s4 }
0x1502   :  { %v1521_v20 = vpop.permute.xlu1 %1520 }
0x1503   :  { %v1523_v21 = vadd.f32 %v1521_v20, %v1513_v19 }
0x1505   :  { %2426 = vtanh.f32 %v1523_v21 }
0x1507   :  { %v1592_v24 = vpop.permute.xlu0 %1591 }
0x1508   :  { %v1594_v25 = vadd.f32 %v1592_v24, %v1584_v23 }
0x150a   :  { %2428 = vtanh.f32 %v1594_v25 }
0x1512   :  { %v2427_v26 = vpop.eup %2426 }
0x1513   :  { %1526 = vrot.lane.b32.xlu1 %v2427_v26, %s2602_s18 }
0x1517   :  { %v2429_v27 = vpop.eup %2428 }
0x1518   :  { %1597 = vrot.lane.b32.xlu0 %v2429_v27, %s2602_s18 }
0x1585   :  { %v1527_v28 = vpop.permute.xlu1 %1526 }
0x1586   :  { %v1529_v29 = vmul.f32 %v2423_v15, %v1527_v28 }
0x1588   :  { %v1602_v30 = vpack.c.bf16 %v1529_v29, %v1529_v29 }
0x158a   :  { %v1598_v36 = vpop.permute.xlu0 %1597  ;;  %1604 = vrot.lane.b32.xlu0 %v1602_v30, %s2609_s4 }
0x158b   :  { %v1600_v31 = vmul.f32 %v2425_v16, %v1598_v36 }
0x158d   :  { %v1601_v38 = vpack.c.bf16 %v1600_v31, %v1600_v31 }
0x158f   :  { %v1650_v37 = vrot.slane %v1601_v38, 3 }
0x1591   :  { %1651 = vrot.lane.b32.xlu1 %v1650_v37, %s2609_s4 }
0x15fc   :  { %v1605_v39 = vpop.permute.xlu0 %1604 }
0x15fd   :  { %2255 = vmatmul.mubr.msk.bf16.vlgmr.msra.gmra.mxu1 %vm170_vm2, %v1605_v39 }
0x15fe   :  { %2270 = vmatprep.mubr.msk.bf16.mxu1 %vm2607_vm0, %v2606_v0 }
0x1603   :  { %v1652_v40 = vpop.permute.xlu1 %1651 }
0x1604   :  { %2263 = vmatmul.mubr.msk.bf16.vlgmr.msra.gmra.mxu0 %vm170_vm2, %v1652_v40 }
0x1605   :  { %2278 = vmatprep.mubr.msk.bf16.mxu0 %vm2607_vm0, %v2606_v0  ;;  %2275 = vmatpush3.bf16.msra.mxu0 %v2308_v4 }
0x1606   :  { %2276 = vmatprep.subr.bf16.mxu0 %v2606_v0 }
0x1609   :  { %2277 = vmatpush3.bf16.msra.mxu0 %v2309_v1 }
0x16bd   :  { %v1643_v41 = vpop.f32.mrf.mxu1 }
0x16bf   :  { %v2256_v42 = vpop.f32.mrf.mxu1 }
0x16c1   :  { %v1646_v43 = vpop.f32.mrf.mxu1 }
0x16c3   :  { %v2257_v44 = vpop.f32.mrf.mxu1 }
0x16c4   :  { %v1690_v45 = vpop.f32.mrf.mxu0 }
0x16c5   :  { %v1691_v47 = vadd.f32 %v1690_v45, %v1643_v41 }
0x16c6   :  { %v2264_v48 = vpop.f32.mrf.mxu0 }
0x16c7   :  { %v1696_v49 = vadd.f32 %v1691_v47, %v2788_v46  ;;  %v2306_v46 = vld [vmem:[#allocation5 + $0x8] sm:$0xff]  }
0x16c8   :  { %v1693_v50 = vpop.f32.mrf.mxu0  ;;  %2267 = vmatpush3.bf16.msra.mxu1 %v2306_v46 }
0x16c9   :  { %2430 = vtanh.f32 %v1696_v49  ;;  %v1980_v53 = vmul.f32 -1.442695, %v1696_v49  ;;  %2268 = vmatprep.subr.bf16.mxu1 %v2606_v0 }
0x16ca   :  { %v2265_v51 = vpop.f32.mrf.mxu0 }
0x16cb   :  { %2432 = vpow2.f32 %v1980_v53 }
0x16cc   :  { %2269 = vmatpush3.bf16.msra.mxu1 %v2307_v61 }
0x16d6   :  { %v2431_v52 = vpop.eup %2430 }
0x16d7   :  { %1706 = vrot.lane.b32.xlu0 %v2431_v52, %s2602_s18 }
0x16d8   :  { %v2433_v12 = vpop.eup %2432 }
0x16d9   :  { %v1700_v54 = vadd.f32 1.0, %v2433_v12 }
0x16db   :  { %2434 = vrcp.f32 %v1700_v54 }
0x16e8   :  { %v2435_v55 = vpop.eup %2434 }
0x16e9   :  { %v1704_v58 = vmul.f32 %v2435_v55, %v1523_v21 }
0x1749   :  { %v1707_v56 = vpop.permute.xlu0 %1706 }
0x174a   :  { %v1709_v57 = vmul.f32 %v2435_v55, %v1707_v56 }
0x174c   :  { %1711 = vrot.lane.b32.xlu1 %v1709_v57, %s2609_s4 }
0x17be   :  { %v1712_v59 = vpop.permute.xlu1 %1711 }
0x17bf   :  { %v1714_v60 = vadd.f32 %v1712_v59, %v1704_v58 }
0x17c1   :  { %2436 = vtanh.f32 %v1714_v60 }
0x17ce   :  { %v2437_v2 = vpop.eup %2436 }
0x17cf   :  { %1717 = vrot.lane.b32.xlu0 %v2437_v2, %s2602_s18  ;;  %s2612_s18 = smov 98  }
0x17d3   :  { %1808 = vrot.lane.b32.xlu0 %v1981_v3, %s2610_s2 }
0x1841   :  { %v1718_v32 = vpop.permute.xlu0 %1717 }
0x1842   :  { %v1720_v33 = vmul.f32 %v2435_v55, %v1718_v32 }
0x1844   :  { %v1721_v62 = vpack.c.bf16 %v1720_v33, %v1720_v33 }
0x1845   :  { %v1809_v35 = vpop.permute.xlu0 %1808 }
0x1846   :  { %1733 = vrot.lane.b32.xlu1 %v1721_v62, %s2609_s4  ;;  %s2530_s4 = scalar_lea.vmem %s1903_s17, 32 }
0x1847   :  { %p2531_p6 = scmp.ne.s32.totalorder %s1903_s17, %s2530_s4  ;;  %p2536_p8 = scmp.lt.s32.totalorder %s2530_s4, %s2530_s4 }
0x1849   :  { %p2537_p9 = por %p2536_p8, %p2535_p7 }
0x184b   :  { %p2538_p10 = pnand %p2537_p9, %p2531_p6 }
0x18b8   :  { %v1734_v63 = vpop.permute.xlu1 %1733 }
0x18b9   :  { %2271 = vmatmul.mubr.msk.bf16.vlgmr.msra.gmra.mxu1 %vm170_vm2, %v1734_v63 }
0x1979   :  { %v1784_v5 = vpop.f32.mrf.mxu1 }
0x197a   :  { %v1785_v6 = vadd.f32 %v1981_v3, %v1784_v5 }
0x197b   :  { %v2272_v7 = vpop.f32.mrf.mxu1 }
0x197c   :  { %v1790_v34 = vmax.f32 %v1785_v6, 0.0 }
0x197d   :  { %v1787_v9 = vpop.f32.mrf.mxu1 }
0x197e   :  { %v1791_v10 = vpack.c.bf16 %v1790_v34, %v1790_v34 }
0x197f   :  { %v2273_v0 = vpop.f32.mrf.mxu1 }
0x1980   :  { %2279 = vmatmul.mubr.msk.bf16.vlgmr.msra.gmra.mxu0 %vm170_vm2, %v1791_v10 }
0x1a40   :  { %v1848_v8 = vpop.f32.mrf.mxu0 }
0x1a41   :  { %v1849_v11 = vadd.f32 %v1848_v8, %v1809_v35 }
0x1a42   :  { %v2280_v15 = vpop.f32.mrf.mxu0 }
0x1a43   :  { %v1865_v13 = vsel %vm1864_vm3, %v1849_v11, -inf  ;;  %v1856_v14 = vmul.f32 1.442695, %v1849_v11  ;;  %1855 = vst.msk [vmem:[#allocation10] sm:$0x3] %vm1854_vm4, %v1849_v11 }
0x1a44   :  { %1866 = vmax.xlane.f32.xlu1 %v1865_v13  ;;  %v1851_v16 = vpop.f32.mrf.mxu0 }
0x1a45   :  { %2438 = vpow2.f32 %v1856_v14 }
0x1a46   :  { %v2281_v17 = vpop.f32.mrf.mxu0 }
0x1a52   :  { %v2439_v18 = vpop.eup %2438 }
0x1a53   :  { %v1858_v19 = vmax.f32 %v2439_v18, 1e-06 }
0x1a55   :  { %1860 = vrot.lane.b32.xlu1 %v1858_v19, %s2611_s3 }
0x1acd   :  { %v1867_v20 = vpop.xlane.xlu1 %1866 }
0x1ace   :  { %v1868_v21 = vsub.f32 %v1849_v11, %v1867_v20 }
0x1ad0   :  { %v1869_v22 = vmul.f32 1.442695, %v1868_v21 }
0x1ad1   :  { %v1861_v23 = vpop.permute.xlu1 %1860 }
0x1ad2   :  { %2440 = vpow2.f32 %v1869_v22  ;;  %1863 = vst.msk [vmem:[#allocation11] sm:$0x3] %vm1854_vm4, %v1861_v23 }
0x1adf   :  { %v2441_v24 = vpop.eup %2440 }
0x1ae0   :  { %1872 = vrot.lane.b32.xlu0 %v2441_v24, %s2612_s18 }
0x1b52   :  { %v1873_v25 = vpop.permute.xlu0 %1872 }
0x1b53   :  { %v1876_v26 = vsel %vm1875_vm5, %v1873_v25, 0.0 }
0x1b54   :  { %1877 = vadd.xlane.f32.xlu0 %v1876_v26 }
0x1bdd   :  { %v1878_v27 = vpop.xlane.xlu0 %1877 }
0x1bde   :  { %2442 = vrcp.f32 %v1878_v27 }
0x1bdf   :  { %2541 = shalt.err (!%p2538_p10)
}
0x1be0   :  { %1905 = dma.vmem_to_hbm [thread:$0]  %s1903_s17, 32, %s3086_s9, [#allocation12]  }
0x1be1   :  { %s2550_s22 = scalar_lea.vmem %s1893_s19, 32  ;;  %p2555_p12 = scmp.lt.s32.totalorder %s1893_s19, %s1893_s19 }
0x1be2   :  { %p2551_p11 = scmp.ne.s32.totalorder %s1893_s19, %s2550_s22  ;;  %p2556_p13 = scmp.lt.s32.totalorder %s2550_s22, %s2550_s22 }
0x1be4   :  { %p2557_p0 = por %p2556_p13, %p2555_p12 }
0x1be6   :  { %p2558_p1 = pnand %p2557_p0, %p2551_p11 }
0x1be8   :  { %2561 = shalt.err (!%p2558_p1)
}
0x1be9   :  { %1895 = dma.vmem_to_hbm [thread:$0]  %s1893_s19, 32, %s3085_s8, [#allocation4]  }
0x1bea   :  { %s2615_s25 = smov [#allocation13]  }
0x1beb   :  { %v2443_v28 = vpop.eup %2442  ;;  %s1912_s26 = sshll.u32 %s2615_s25, 4  ;;  %s1913_s26 = int_to_ptr.vmem [resolvable:$true] %s1912_s26 }
0x1bec   :  { %v1880_v29 = vmul.f32 %v2443_v28, %v2441_v24  ;;  %s2570_s9 = scalar_lea.vmem %s1913_s26, 32  ;;  %p2575_p3 = scmp.lt.s32.totalorder %s1913_s26, %s1913_s26 }
0x1bed   :  { %p2571_p2 = scmp.ne.s32.totalorder %s1913_s26, %s2570_s9  ;;  %p2576_p4 = scmp.lt.s32.totalorder %s2570_s9, %s2570_s9 }
0x1bee   :  { %1882 = vrot.lane.b32.xlu0 %v1880_v29, %s2612_s18 }
0x1bef   :  { %p2577_p5 = por %p2576_p4, %p2575_p3 }
0x1bf1   :  { %p2578_p6 = pnand %p2577_p5, %p2571_p2 }
0x1c60   :  { %v1883_v30 = vpop.permute.xlu0 %1882 }
0x1c61   :  { %1885 = vst.msk [vmem:[#allocation13] sm:$0x3] %vm1875_vm5, %v1883_v30 }
0x1c62   :  { %2581 = shalt.err (!%p2578_p6)
}
0x1c63   :  { %1915 = dma.vmem_to_hbm [thread:$0]  %s1913_s26, 32, %s3087_s10, [#allocation12]  }
0x1c64   :  { %2596 = dma.done.wait [#allocation4], 32  }
0x1c65   :  { %2597 = vsyncadd [#allocation4], 4294967264 }
0x1c66   :  { %2598 = dma.done.wait [#allocation12], 64  }
0x1c67   :  { %2599 = vsyncadd [#allocation12], 4294967232 }
0x1c68   :  { %1925 = vsyncpa [#allocation3], 1 }
0x1c69   :  { %1926 = vsyncpa [#allocation6], 1 }
0x1c6a   :  { %1927 = vsyncpa [#allocation9], 1 }
0x1c6b   :  { %1928 = vsyncpa [#allocation4], 1 }
0x1c6c   :  { %1929 = vsyncpa [#allocation12], 1 }

</bundles_post_ra>
